<compile_context>
chip_gen: v6e
topology: v6e:2x2x1
jax: 0.10.0
libtpu: 0.0.40
codegen_flags: <defaults>
</compile_context>

<pallas_src>
import jax
import jax.numpy as jnp
from jax.experimental import pallas as pl
from jax.experimental.pallas import tpu as pltpu

EPS = 1e-5
LANE = 128


def _silu(x):
    return x * jax.nn.sigmoid(x)


def _batchnorm(x, gamma, beta):
    # nn.BatchNorm1d training-mode batch stats (biased variance), two-pass for
    # numerical robustness.
    mean = jnp.mean(x, axis=0, keepdims=True)
    xc = x - mean
    var = jnp.mean(xc * xc, axis=0, keepdims=True)
    return xc * jax.lax.rsqrt(var + EPS) * gamma + beta


# ------------------------------ fused kernel --------------------------------

def _make_fused_kernel(*, n_layers, out_features, out_lanes, chunk_bounds,
                       vec_widths):
    """chunk_bounds: tuple of static (start, stop) edge-chunk boundaries.
    vec_widths:   per-row widths of the packed bias/BN vector slab."""

    def kernel(idx_sub_ref, row_lane_ref, edge_ref, node_ref, vec_ref,
               pe_w1_ref, pe_w2_ref, pn_w1_ref, pn_w2_ref,
               ew1_ref, ew2_ref, nw1_ref, nw2_ref, nw3_ref,
               head_w1_ref, head_w2_ref, out_ref):
        E = edge_ref.shape[0]
        N = node_ref.shape[0]
        M = ew2_ref.shape[2]          # message vector length

        def V(i):                     # packed bias / BN vector row i -> (1, w) f32
            return vec_ref[i:i + 1, :vec_widths[i]]

        def preproc(x, w1_ref, w2_ref, vi):
            # BN -> Linear -> BN -> SiLU -> Linear -> SiLU   (preproc_*_mlp)
            x = _batchnorm(x, V(vi), V(vi + 1))
            x = jnp.dot(x.astype(jnp.bfloat16), w1_ref[...],
                        preferred_element_type=jnp.float32) + V(vi + 2)
            x = _silu(_batchnorm(x, V(vi + 3), V(vi + 4)))
            x = jnp.dot(x.astype(jnp.bfloat16), w2_ref[...],
                        preferred_element_type=jnp.float32) + V(vi + 5)
            return _silu(x)

        # --- preprocessing MLPs (activations stay on-chip from here on) -----
        edge_proj = preproc(edge_ref[...], pe_w1_ref, pe_w2_ref, 0)   # (E, P)
        h = preproc(node_ref[...], pn_w1_ref, pn_w2_ref, 6)           # (N, H)

        idx_sub = idx_sub_ref[...]    # (2E, 1) int32, [row ; col] on sublanes
        row_lane = row_lane_ref[...]  # (1, E)  int32, lane-dense row indices

        def build_onehots(c0, c1):
            te = c1 - c0
            idx_chunk = jnp.concatenate(
                [idx_sub[c0:c1], idx_sub[E + c0:E + c1]], axis=0)     # (2te, 1)
            oh_gather = (idx_chunk ==
                         jax.lax.broadcasted_iota(jnp.int32, (2 * te, N), 1)
                         ).astype(jnp.bfloat16)                       # (2te, N)
            oh_scatter = (row_lane[:, c0:c1] ==
                          jax.lax.broadcasted_iota(jnp.int32, (N, te), 0)
                          ).astype(jnp.bfloat16)                      # (N, te)
            return oh_gather, oh_scatter

        # Single-chunk case (small graphs): one-hots are tiny and layer-invariant,
        # build them once.  Multi-chunk: rebuild per chunk to keep VMEM bounded.
        cached = ([build_onehots(c0, c1) for (c0, c1) in chunk_bounds]
                  if len(chunk_bounds) == 1 else None)

        for l in range(n_layers):
            vi = 12 + 7 * l
            eb1, eb2, ng, nb, nb1, nb2, nb3 = (V(vi + k) for k in range(7))
            ew1 = ew1_ref[l]          # (P+2H, Q) bf16
            ew2 = ew2_ref[l]          # (Q, M)    bf16
            nw1 = nw1_ref[l]          # (M+H, Q)  bf16
            nw2 = nw2_ref[l]          # (Q, Q)    bf16
            nw3 = nw3_ref[l]          # (Q, H)    bf16

            h_bf = h.astype(jnp.bfloat16)
            summed = jnp.zeros((N, M), jnp.float32)

            for ci, (c0, c1) in enumerate(chunk_bounds):
                te = c1 - c0
                oh_gather, oh_scatter = (cached[ci] if cached is not None
                                         else build_onehots(c0, c1))

                # Gather h[row], h[col] in ONE canonical matmul: (2te,N)@(N,H).
                gathered = jnp.dot(oh_gather, h_bf,
                                   preferred_element_type=jnp.float32)
                h_src = gathered[:te]
                h_tgt = gathered[te:]

                # edge_mlp: Linear(P+2H -> Q), SiLU, Linear(Q -> M), SiLU
                cat_e = jnp.concatenate([edge_proj[c0:c1], h_src, h_tgt], axis=1)
                msg = _silu(jnp.dot(cat_e.astype(jnp.bfloat16), ew1,
                                    preferred_element_type=jnp.float32) + eb1)
                msg = _silu(jnp.dot(msg.astype(jnp.bfloat16), ew2,
                                    preferred_element_type=jnp.float32) + eb2)

                # sum_messages (scatter_add over source node): (N,te)@(te,M).
                summed = summed + jnp.dot(oh_scatter, msg.astype(jnp.bfloat16),
                                          preferred_element_type=jnp.float32)

            # node_mlp: BN(M+H) -> Linear -> SiLU -> Linear -> SiLU -> Linear,
            # then residual add (all in f32 except the MXU operands).
            cat_n = jnp.concatenate([summed, h], axis=1)
            y = _batchnorm(cat_n, ng, nb)
            y = _silu(jnp.dot(y.astype(jnp.bfloat16), nw1,
                              preferred_element_type=jnp.float32) + nb1)
            y = _silu(jnp.dot(y.astype(jnp.bfloat16), nw2,
                              preferred_element_type=jnp.float32) + nb2)
            y = jnp.dot(y.astype(jnp.bfloat16), nw3,
                        preferred_element_type=jnp.float32) + nb3
            h = h + y

        # --- fused output / attention heads (last layer only) ----------------
        vi = 12 + 7 * n_layers
        a1 = _silu(jnp.dot(h.astype(jnp.bfloat16), head_w1_ref[...],
                           preferred_element_type=jnp.float32) + V(vi))   # (N,2Q)
        r = jnp.dot(a1.astype(jnp.bfloat16), head_w2_ref[...],
                    preferred_element_type=jnp.float32) + V(vi + 1)       # (N,O+1)
        col_iota = jax.lax.broadcasted_iota(jnp.int32, r.shape, 1)
        r = jnp.where(col_iota == out_features, jax.nn.sigmoid(r), r)

        # ONE unmasked lane-dense store of the whole output slab.
        pad_w = out_lanes - r.shape[1]
        if pad_w > 0:
            r = jnp.concatenate([r, jnp.zeros((N, pad_w), jnp.float32)], axis=1)
        out_ref[...] = r

    return kernel


# ------------------------------- call glue ----------------------------------

def _full_spec(shape):
    nd = len(shape)
    return pl.BlockSpec(tuple(int(s) for s in shape), lambda *_: (0,) * nd)


def alignment_gnn_forward(params, edges, edge_attr, node_attr, *,
                          nmb_output_features, edge_chunk=512):
    E = edge_attr.shape[0]
    N = node_attr.shape[0]
    O = nmb_output_features
    out_lanes = max(LANE, -(-(O + 1) // LANE) * LANE)

    row = edges[0].astype(jnp.int32)
    col = edges[1].astype(jnp.int32)
    idx_sub = jnp.concatenate([row, col], axis=0).reshape(2 * E, 1)
    row_lane = row.reshape(1, E)

    # ---------------- pack parameters into a handful of arrays --------------
    vecs = []

    def add_vec(v):
        vecs.append(v.reshape(1, -1))

    g1, be1, w1, b1, g2, be2, w2, b2 = params["pe"]
    for v in (g1, be1, b1, g2, be2, b2):
        add_vec(v)
    pe_w1, pe_w2 = w1, w2

    g1, be1, w1, b1, g2, be2, w2, b2 = params["pn"]
    for v in (g1, be1, b1, g2, be2, b2):
        add_vec(v)
    pn_w1, pn_w2 = w1, w2

    ew1s, ew2s, nw1s, nw2s, nw3s = [], [], [], [], []
    for (ew1, eb1, ew2, eb2, ng, nb,
         nw1, nb1, nw2, nb2, nw3, nb3) in params["layers"]:
        for v in (eb1, eb2, ng, nb, nb1, nb2, nb3):
            add_vec(v)
        ew1s.append(ew1); ew2s.append(ew2)
        nw1s.append(nw1); nw2s.append(nw2); nw3s.append(nw3)

    ow1, ob1, ow2, ob2, aw1, ab1, aw2, ab2 = params["head"]
    head_w1 = jnp.concatenate([ow1, aw1], axis=1)            # (H, 2Q)
    Qh = ow2.shape[0]
    head_w2 = jnp.zeros((2 * Qh, O + 1), jnp.float32)        # block-diag [ow2 0;0 aw2]
    head_w2 = head_w2.at[:Qh, :O].set(ow2)
    head_w2 = head_w2.at[Qh:, O:].set(aw2)
    add_vec(jnp.concatenate([ob1, ab1], axis=1))
    add_vec(jnp.concatenate([ob2, ab2], axis=1))

    vec_widths = tuple(int(v.shape[1]) for v in vecs)
    vec_lane = max(LANE, -(-max(vec_widths) // LANE) * LANE)
    vec_packed = jnp.concatenate(
        [jnp.pad(v, ((0, 0), (0, vec_lane - v.shape[1]))) for v in vecs], axis=0)

    bf = lambda x: x.astype(jnp.bfloat16)     # bf16 MXU weights (f32 accumulation)
    mats = [bf(pe_w1), bf(pe_w2), bf(pn_w1), bf(pn_w2),
            bf(jnp.stack(ew1s)), bf(jnp.stack(ew2s)),
            bf(jnp.stack(nw1s)), bf(jnp.stack(nw2s)), bf(jnp.stack(nw3s)),
            bf(head_w1), bf(head_w2)]

    # Edge chunking bounds the one-hot VMEM footprint (v7x has 64 MiB per TC).
    TE = min(edge_chunk, E)
    chunk_bounds = tuple((s, min(s + TE, E)) for s in range(0, E, TE))

    inputs = [idx_sub, row_lane, edge_attr, node_attr, vec_packed] + mats

    kernel = _make_fused_kernel(
        n_layers=len(params["layers"]), out_features=O, out_lanes=out_lanes,
        chunk_bounds=chunk_bounds, vec_widths=vec_widths)

    # VMEM budget sized to the real footprint (inputs double-buffered by the
    # pipeline, plus one-hots / activations), clamped to a safe range.
    in_bytes = sum(int(a.size) * a.dtype.itemsize for a in inputs)
    out_bytes = N * out_lanes * 4
    H = pn_w2.shape[1]; M = ew2s[0].shape[1]
    Q = pe_w1.shape[1]; P = pe_w2.shape[1]
    act_bytes = (4 * N * TE * 4
                 + 8 * TE * (P + 2 * H + 2 * Q + M) * 4
                 + 8 * N * (M + H + 3 * Q) * 4)
    vmem_limit = int(min(max(2 * (in_bytes + out_bytes) + act_bytes + (4 << 20),
                             32 << 20), 64 << 20))

    slab = pl.pallas_call(
        kernel,
        grid=(1,),
        in_specs=[_full_spec(a.shape) for a in inputs],
        out_specs=_full_spec((N, out_lanes)),
        out_shape=jax.ShapeDtypeStruct((N, out_lanes), jnp.float32),
        compiler_params=pltpu.CompilerParams(
            dimension_semantics=("arbitrary",),
            vmem_limit_bytes=vmem_limit),
    )(*inputs)
    return slab[:, :O], slab[:, O:O + 1]


# ------------------------- deterministic parameters -------------------------

def _linear_params(key, fan_in, fan_out):
    kw, kb = jax.random.split(key)
    bound = 1.0 / float(fan_in) ** 0.5
    w = jax.random.uniform(kw, (fan_in, fan_out), jnp.float32, -bound, bound)
    b = jax.random.uniform(kb, (1, fan_out), jnp.float32, -bound, bound)
    return w, b


def _bn_params(dim):
    return jnp.ones((1, dim), jnp.float32), jnp.zeros((1, dim), jnp.float32)


def init_params(key, nmb_edge_attr, nmb_node_attr, nmb_output_features,
                nmb_hidden_attr, message_vector_length, nmb_mlp_neurons,
                nmb_gnn_layers, nmb_edge_projection):
    n_linear = 4 + 5 * nmb_gnn_layers + 4
    keys = iter(jax.random.split(key, n_linear))

    def preproc(in_dim, out_dim):
        g1, b1 = _bn_params(in_dim)
        w1, bb1 = _linear_params(next(keys), in_dim, nmb_mlp_neurons)
        g2, b2 = _bn_params(nmb_mlp_neurons)
        w2, bb2 = _linear_params(next(keys), nmb_mlp_neurons, out_dim)
        return [g1, b1, w1, bb1, g2, b2, w2, bb2]

    p = {
        "pe": preproc(nmb_edge_attr, nmb_edge_projection),
        "pn": preproc(nmb_node_attr, nmb_hidden_attr),
        "layers": [],
    }
    for _ in range(nmb_gnn_layers):
        ew1, eb1 = _linear_params(next(keys),
                                  nmb_edge_projection + 2 * nmb_hidden_attr,
                                  nmb_mlp_neurons)
        ew2, eb2 = _linear_params(next(keys), nmb_mlp_neurons,
                                  message_vector_length)
        ng, nb = _bn_params(message_vector_length + nmb_hidden_attr)
        nw1, nb1 = _linear_params(next(keys),
                                  message_vector_length + nmb_hidden_attr,
                                  nmb_mlp_neurons)
        nw2, nb2 = _linear_params(next(keys), nmb_mlp_neurons, nmb_mlp_neurons)
        nw3, nb3 = _linear_params(next(keys), nmb_mlp_neurons, nmb_hidden_attr)
        p["layers"].append([ew1, eb1, ew2, eb2, ng, nb,
                            nw1, nb1, nw2, nb2, nw3, nb3])
    ow1, ob1 = _linear_params(next(keys), nmb_hidden_attr, nmb_mlp_neurons)
    ow2, ob2 = _linear_params(next(keys), nmb_mlp_neurons, nmb_output_features)
    aw1, ab1 = _linear_params(next(keys), nmb_hidden_attr, nmb_mlp_neurons)
    aw2, ab2 = _linear_params(next(keys), nmb_mlp_neurons, 1)
    p["head"] = [ow1, ob1, ow2, ob2, aw1, ab1, aw2, ab2]
    return p


# ---------------------------------- main -------------------------------------

if __name__ == "__main__":
    # Small, module-consistent configuration.
    nmb_edge_attr = 6
    nmb_node_attr = 10
    nmb_output_features = 2
    nmb_hidden_attr = 16
    message_vector_length = 8
    nmb_mlp_neurons = 32
    nmb_gnn_layers = 2
    nmb_edge_projection = 12
    N, E = 12, 24

    key = jax.random.PRNGKey(0)
    kp, ke, kn, kr, kc = jax.random.split(key, 5)
    params = init_params(kp, nmb_edge_attr, nmb_node_attr, nmb_output_features,
                         nmb_hidden_attr, message_vector_length, nmb_mlp_neurons,
                         nmb_gnn_layers, nmb_edge_projection)

    edge_attr = jax.random.normal(ke, (E, nmb_edge_attr), jnp.float32)
    node_attr = jax.random.normal(kn, (N, nmb_node_attr), jnp.float32)
    row = jax.random.randint(kr, (E,), 0, N, jnp.int32)
    col = jax.random.randint(kc, (E,), 0, N, jnp.int32)
    edges = jnp.stack([row, col], axis=0)   # shape (2, E)

    fwd = jax.jit(lambda p, e, ea, na: alignment_gnn_forward(
        p, e, ea, na, nmb_output_features=nmb_output_features))
    out, attn = fwd(params, edges, edge_attr, node_attr)
    jax.block_until_ready((out, attn))
    assert out.shape == (N, nmb_output_features) and attn.shape == (N, 1)
    assert bool(jnp.all(jnp.isfinite(out))) and bool(jnp.all(jnp.isfinite(attn)))
    assert bool(jnp.all(attn >= 0.0)) and bool(jnp.all(attn <= 1.0))
    print("KERNEL_OK")
</pallas_src>

<mosaic_0001>
module attributes {stable_mosaic.version = 11 : i64} {
  func.func @kernel(%arg0: i32, %arg1: memref<48x1xi32, #tpu.memory_space<vmem>>, %arg2: memref<1x24xi32, #tpu.memory_space<vmem>>, %arg3: memref<24x6xf32, #tpu.memory_space<vmem>>, %arg4: memref<12x10xf32, #tpu.memory_space<vmem>>, %arg5: memref<28x128xf32, #tpu.memory_space<vmem>>, %arg6: memref<6x32xbf16, #tpu.memory_space<vmem>>, %arg7: memref<32x12xbf16, #tpu.memory_space<vmem>>, %arg8: memref<10x32xbf16, #tpu.memory_space<vmem>>, %arg9: memref<32x16xbf16, #tpu.memory_space<vmem>>, %arg10: memref<2x44x32xbf16, #tpu.memory_space<vmem>>, %arg11: memref<2x32x8xbf16, #tpu.memory_space<vmem>>, %arg12: memref<2x24x32xbf16, #tpu.memory_space<vmem>>, %arg13: memref<2x32x32xbf16, #tpu.memory_space<vmem>>, %arg14: memref<2x32x16xbf16, #tpu.memory_space<vmem>>, %arg15: memref<16x64xbf16, #tpu.memory_space<vmem>>, %arg16: memref<64x3xbf16, #tpu.memory_space<vmem>>, %arg17: memref<12x128xf32, #tpu.memory_space<vmem>>) attributes {dimension_semantics = [#tpu.dimension_semantics<arbitrary>], iteration_bounds = array<i64: 1>, scalar_prefetch = 0 : i64, scratch_operands = 0 : i64, tpu.core_type = #tpu.core_type<tc>, window_params = [{pipeline_mode = #tpu.pipeline_mode<synchronous>, transform_indices = @transform_0, window_bounds = array<i64: 48, 1>}, {pipeline_mode = #tpu.pipeline_mode<synchronous>, transform_indices = @transform_1, window_bounds = array<i64: 1, 24>}, {pipeline_mode = #tpu.pipeline_mode<synchronous>, transform_indices = @transform_2, window_bounds = array<i64: 24, 6>}, {pipeline_mode = #tpu.pipeline_mode<synchronous>, transform_indices = @transform_3, window_bounds = array<i64: 12, 10>}, {pipeline_mode = #tpu.pipeline_mode<synchronous>, transform_indices = @transform_4, window_bounds = array<i64: 28, 128>}, {pipeline_mode = #tpu.pipeline_mode<synchronous>, transform_indices = @transform_5, window_bounds = array<i64: 6, 32>}, {pipeline_mode = #tpu.pipeline_mode<synchronous>, transform_indices = @transform_6, window_bounds = array<i64: 32, 12>}, {pipeline_mode = #tpu.pipeline_mode<synchronous>, transform_indices = @transform_7, window_bounds = array<i64: 10, 32>}, {pipeline_mode = #tpu.pipeline_mode<synchronous>, transform_indices = @transform_8, window_bounds = array<i64: 32, 16>}, {pipeline_mode = #tpu.pipeline_mode<synchronous>, transform_indices = @transform_9, window_bounds = array<i64: 2, 44, 32>}, {pipeline_mode = #tpu.pipeline_mode<synchronous>, transform_indices = @transform_10, window_bounds = array<i64: 2, 32, 8>}, {pipeline_mode = #tpu.pipeline_mode<synchronous>, transform_indices = @transform_11, window_bounds = array<i64: 2, 24, 32>}, {pipeline_mode = #tpu.pipeline_mode<synchronous>, transform_indices = @transform_12, window_bounds = array<i64: 2, 32, 32>}, {pipeline_mode = #tpu.pipeline_mode<synchronous>, transform_indices = @transform_13, window_bounds = array<i64: 2, 32, 16>}, {pipeline_mode = #tpu.pipeline_mode<synchronous>, transform_indices = @transform_14, window_bounds = array<i64: 16, 64>}, {pipeline_mode = #tpu.pipeline_mode<synchronous>, transform_indices = @transform_15, window_bounds = array<i64: 64, 3>}, {pipeline_mode = #tpu.pipeline_mode<synchronous>, transform_indices = @transform_16, window_bounds = array<i64: 12, 128>}]} {
    %c0 = arith.constant 0 : index
    %c0_0 = arith.constant 0 : index
    %0 = vector.load %arg3[%c0, %c0_0] : memref<24x6xf32, #tpu.memory_space<vmem>>, vector<24x6xf32>
    %c0_1 = arith.constant 0 : index
    %c0_2 = arith.constant 0 : index
    %1 = vector.load %arg5[%c0_1, %c0_2] : memref<28x128xf32, #tpu.memory_space<vmem>>, vector<1x6xf32>
    %c1 = arith.constant 1 : index
    %c0_3 = arith.constant 0 : index
    %2 = vector.load %arg5[%c1, %c0_3] : memref<28x128xf32, #tpu.memory_space<vmem>>, vector<1x6xf32>
    %cst = arith.constant dense<0.000000e+00> : vector<6xf32>
    %3 = vector.multi_reduction <add>, %0, %cst [0] : vector<24x6xf32> to vector<6xf32>
    %4 = vector.shape_cast %3 : vector<6xf32> to vector<1x6xf32>
    %cst_4 = arith.constant 2.400000e+01 : f32
    %5 = vector.broadcast %cst_4 : f32 to vector<1x6xf32>
    %6 = arith.divf %4, %5 : vector<1x6xf32>
    %7 = vector.broadcast %6 : vector<1x6xf32> to vector<24x6xf32>
    %8 = arith.subf %0, %7 : vector<24x6xf32>
    %9 = arith.mulf %8, %8 : vector<24x6xf32>
    %cst_5 = arith.constant dense<0.000000e+00> : vector<6xf32>
    %10 = vector.multi_reduction <add>, %9, %cst_5 [0] : vector<24x6xf32> to vector<6xf32>
    %11 = vector.shape_cast %10 : vector<6xf32> to vector<1x6xf32>
    %cst_6 = arith.constant 2.400000e+01 : f32
    %12 = vector.broadcast %cst_6 : f32 to vector<1x6xf32>
    %13 = arith.divf %11, %12 : vector<1x6xf32>
    %cst_7 = arith.constant 9.99999974E-6 : f32
    %14 = vector.broadcast %cst_7 : f32 to vector<1x6xf32>
    %15 = arith.addf %13, %14 : vector<1x6xf32>
    %16 = math.rsqrt %15 : vector<1x6xf32>
    %17 = vector.broadcast %16 : vector<1x6xf32> to vector<24x6xf32>
    %18 = arith.mulf %8, %17 : vector<24x6xf32>
    %19 = vector.broadcast %1 : vector<1x6xf32> to vector<24x6xf32>
    %20 = arith.mulf %18, %19 : vector<24x6xf32>
    %21 = vector.broadcast %2 : vector<1x6xf32> to vector<24x6xf32>
    %22 = arith.addf %20, %21 : vector<24x6xf32>
    %23 = arith.truncf %22 : vector<24x6xf32> to vector<24x6xbf16>
    %c0_8 = arith.constant 0 : index
    %c0_9 = arith.constant 0 : index
    %24 = vector.load %arg6[%c0_8, %c0_9] : memref<6x32xbf16, #tpu.memory_space<vmem>>, vector<6x32xbf16>
    %cst_10 = arith.constant dense<0.000000e+00> : vector<24x32xf32>
    %25 = tpu.matmul %23, %24, %cst_10 {dimension_numbers = #tpu.dot_dimension_numbers<[1], [0], [0], [1], [0, 0, 1, 1], [], []>} : vector<24x6xbf16>, vector<6x32xbf16>, vector<24x32xf32> -> vector<24x32xf32>
    %c2 = arith.constant 2 : index
    %c0_11 = arith.constant 0 : index
    %26 = vector.load %arg5[%c2, %c0_11] : memref<28x128xf32, #tpu.memory_space<vmem>>, vector<1x32xf32>
    %27 = vector.broadcast %26 : vector<1x32xf32> to vector<24x32xf32>
    %28 = arith.addf %25, %27 : vector<24x32xf32>
    %c3 = arith.constant 3 : index
    %c0_12 = arith.constant 0 : index
    %29 = vector.load %arg5[%c3, %c0_12] : memref<28x128xf32, #tpu.memory_space<vmem>>, vector<1x32xf32>
    %c4 = arith.constant 4 : index
    %c0_13 = arith.constant 0 : index
    %30 = vector.load %arg5[%c4, %c0_13] : memref<28x128xf32, #tpu.memory_space<vmem>>, vector<1x32xf32>
    %cst_14 = arith.constant dense<0.000000e+00> : vector<32xf32>
    %31 = vector.multi_reduction <add>, %28, %cst_14 [0] : vector<24x32xf32> to vector<32xf32>
    %32 = vector.shape_cast %31 : vector<32xf32> to vector<1x32xf32>
    %cst_15 = arith.constant 2.400000e+01 : f32
    %33 = vector.broadcast %cst_15 : f32 to vector<1x32xf32>
    %34 = arith.divf %32, %33 : vector<1x32xf32>
    %35 = vector.broadcast %34 : vector<1x32xf32> to vector<24x32xf32>
    %36 = arith.subf %28, %35 : vector<24x32xf32>
    %37 = arith.mulf %36, %36 : vector<24x32xf32>
    %cst_16 = arith.constant dense<0.000000e+00> : vector<32xf32>
    %38 = vector.multi_reduction <add>, %37, %cst_16 [0] : vector<24x32xf32> to vector<32xf32>
    %39 = vector.shape_cast %38 : vector<32xf32> to vector<1x32xf32>
    %cst_17 = arith.constant 2.400000e+01 : f32
    %40 = vector.broadcast %cst_17 : f32 to vector<1x32xf32>
    %41 = arith.divf %39, %40 : vector<1x32xf32>
    %cst_18 = arith.constant 9.99999974E-6 : f32
    %42 = vector.broadcast %cst_18 : f32 to vector<1x32xf32>
    %43 = arith.addf %41, %42 : vector<1x32xf32>
    %44 = math.rsqrt %43 : vector<1x32xf32>
    %45 = vector.broadcast %44 : vector<1x32xf32> to vector<24x32xf32>
    %46 = arith.mulf %36, %45 : vector<24x32xf32>
    %47 = vector.broadcast %29 : vector<1x32xf32> to vector<24x32xf32>
    %48 = arith.mulf %46, %47 : vector<24x32xf32>
    %49 = vector.broadcast %30 : vector<1x32xf32> to vector<24x32xf32>
    %50 = arith.addf %48, %49 : vector<24x32xf32>
    %51 = arith.negf %50 : vector<24x32xf32>
    %52 = math.exp %51 : vector<24x32xf32>
    %cst_19 = arith.constant 1.000000e+00 : f32
    %53 = vector.broadcast %cst_19 : f32 to vector<24x32xf32>
    %54 = arith.addf %53, %52 : vector<24x32xf32>
    %55 = arith.divf %53, %54 : vector<24x32xf32>
    %56 = arith.mulf %50, %55 : vector<24x32xf32>
    %57 = arith.truncf %56 : vector<24x32xf32> to vector<24x32xbf16>
    %c0_20 = arith.constant 0 : index
    %c0_21 = arith.constant 0 : index
    %58 = vector.load %arg7[%c0_20, %c0_21] : memref<32x12xbf16, #tpu.memory_space<vmem>>, vector<32x12xbf16>
    %cst_22 = arith.constant dense<0.000000e+00> : vector<24x12xf32>
    %59 = tpu.matmul %57, %58, %cst_22 {dimension_numbers = #tpu.dot_dimension_numbers<[1], [0], [0], [1], [0, 0, 1, 1], [], []>} : vector<24x32xbf16>, vector<32x12xbf16>, vector<24x12xf32> -> vector<24x12xf32>
    %c5 = arith.constant 5 : index
    %c0_23 = arith.constant 0 : index
    %60 = vector.load %arg5[%c5, %c0_23] : memref<28x128xf32, #tpu.memory_space<vmem>>, vector<1x12xf32>
    %61 = vector.broadcast %60 : vector<1x12xf32> to vector<24x12xf32>
    %62 = arith.addf %59, %61 : vector<24x12xf32>
    %63 = arith.negf %62 : vector<24x12xf32>
    %64 = math.exp %63 : vector<24x12xf32>
    %cst_24 = arith.constant 1.000000e+00 : f32
    %65 = vector.broadcast %cst_24 : f32 to vector<24x12xf32>
    %66 = arith.addf %65, %64 : vector<24x12xf32>
    %67 = arith.divf %65, %66 : vector<24x12xf32>
    %68 = arith.mulf %62, %67 : vector<24x12xf32>
    %c0_25 = arith.constant 0 : index
    %c0_26 = arith.constant 0 : index
    %69 = vector.load %arg4[%c0_25, %c0_26] : memref<12x10xf32, #tpu.memory_space<vmem>>, vector<12x10xf32>
    %c6 = arith.constant 6 : index
    %c0_27 = arith.constant 0 : index
    %70 = vector.load %arg5[%c6, %c0_27] : memref<28x128xf32, #tpu.memory_space<vmem>>, vector<1x10xf32>
    %c7 = arith.constant 7 : index
    %c0_28 = arith.constant 0 : index
    %71 = vector.load %arg5[%c7, %c0_28] : memref<28x128xf32, #tpu.memory_space<vmem>>, vector<1x10xf32>
    %cst_29 = arith.constant dense<0.000000e+00> : vector<10xf32>
    %72 = vector.multi_reduction <add>, %69, %cst_29 [0] : vector<12x10xf32> to vector<10xf32>
    %73 = vector.shape_cast %72 : vector<10xf32> to vector<1x10xf32>
    %cst_30 = arith.constant 1.200000e+01 : f32
    %74 = vector.broadcast %cst_30 : f32 to vector<1x10xf32>
    %75 = arith.divf %73, %74 : vector<1x10xf32>
    %76 = vector.broadcast %75 : vector<1x10xf32> to vector<12x10xf32>
    %77 = arith.subf %69, %76 : vector<12x10xf32>
    %78 = arith.mulf %77, %77 : vector<12x10xf32>
    %cst_31 = arith.constant dense<0.000000e+00> : vector<10xf32>
    %79 = vector.multi_reduction <add>, %78, %cst_31 [0] : vector<12x10xf32> to vector<10xf32>
    %80 = vector.shape_cast %79 : vector<10xf32> to vector<1x10xf32>
    %cst_32 = arith.constant 1.200000e+01 : f32
    %81 = vector.broadcast %cst_32 : f32 to vector<1x10xf32>
    %82 = arith.divf %80, %81 : vector<1x10xf32>
    %cst_33 = arith.constant 9.99999974E-6 : f32
    %83 = vector.broadcast %cst_33 : f32 to vector<1x10xf32>
    %84 = arith.addf %82, %83 : vector<1x10xf32>
    %85 = math.rsqrt %84 : vector<1x10xf32>
    %86 = vector.broadcast %85 : vector<1x10xf32> to vector<12x10xf32>
    %87 = arith.mulf %77, %86 : vector<12x10xf32>
    %88 = vector.broadcast %70 : vector<1x10xf32> to vector<12x10xf32>
    %89 = arith.mulf %87, %88 : vector<12x10xf32>
    %90 = vector.broadcast %71 : vector<1x10xf32> to vector<12x10xf32>
    %91 = arith.addf %89, %90 : vector<12x10xf32>
    %92 = arith.truncf %91 : vector<12x10xf32> to vector<12x10xbf16>
    %c0_34 = arith.constant 0 : index
    %c0_35 = arith.constant 0 : index
    %93 = vector.load %arg8[%c0_34, %c0_35] : memref<10x32xbf16, #tpu.memory_space<vmem>>, vector<10x32xbf16>
    %cst_36 = arith.constant dense<0.000000e+00> : vector<12x32xf32>
    %94 = tpu.matmul %92, %93, %cst_36 {dimension_numbers = #tpu.dot_dimension_numbers<[1], [0], [0], [1], [0, 0, 1, 1], [], []>} : vector<12x10xbf16>, vector<10x32xbf16>, vector<12x32xf32> -> vector<12x32xf32>
    %c8 = arith.constant 8 : index
    %c0_37 = arith.constant 0 : index
    %95 = vector.load %arg5[%c8, %c0_37] : memref<28x128xf32, #tpu.memory_space<vmem>>, vector<1x32xf32>
    %96 = vector.broadcast %95 : vector<1x32xf32> to vector<12x32xf32>
    %97 = arith.addf %94, %96 : vector<12x32xf32>
    %c9 = arith.constant 9 : index
    %c0_38 = arith.constant 0 : index
    %98 = vector.load %arg5[%c9, %c0_38] : memref<28x128xf32, #tpu.memory_space<vmem>>, vector<1x32xf32>
    %c10 = arith.constant 10 : index
    %c0_39 = arith.constant 0 : index
    %99 = vector.load %arg5[%c10, %c0_39] : memref<28x128xf32, #tpu.memory_space<vmem>>, vector<1x32xf32>
    %cst_40 = arith.constant dense<0.000000e+00> : vector<32xf32>
    %100 = vector.multi_reduction <add>, %97, %cst_40 [0] : vector<12x32xf32> to vector<32xf32>
    %101 = vector.shape_cast %100 : vector<32xf32> to vector<1x32xf32>
    %cst_41 = arith.constant 1.200000e+01 : f32
    %102 = vector.broadcast %cst_41 : f32 to vector<1x32xf32>
    %103 = arith.divf %101, %102 : vector<1x32xf32>
    %104 = vector.broadcast %103 : vector<1x32xf32> to vector<12x32xf32>
    %105 = arith.subf %97, %104 : vector<12x32xf32>
    %106 = arith.mulf %105, %105 : vector<12x32xf32>
    %cst_42 = arith.constant dense<0.000000e+00> : vector<32xf32>
    %107 = vector.multi_reduction <add>, %106, %cst_42 [0] : vector<12x32xf32> to vector<32xf32>
    %108 = vector.shape_cast %107 : vector<32xf32> to vector<1x32xf32>
    %cst_43 = arith.constant 1.200000e+01 : f32
    %109 = vector.broadcast %cst_43 : f32 to vector<1x32xf32>
    %110 = arith.divf %108, %109 : vector<1x32xf32>
    %cst_44 = arith.constant 9.99999974E-6 : f32
    %111 = vector.broadcast %cst_44 : f32 to vector<1x32xf32>
    %112 = arith.addf %110, %111 : vector<1x32xf32>
    %113 = math.rsqrt %112 : vector<1x32xf32>
    %114 = vector.broadcast %113 : vector<1x32xf32> to vector<12x32xf32>
    %115 = arith.mulf %105, %114 : vector<12x32xf32>
    %116 = vector.broadcast %98 : vector<1x32xf32> to vector<12x32xf32>
    %117 = arith.mulf %115, %116 : vector<12x32xf32>
    %118 = vector.broadcast %99 : vector<1x32xf32> to vector<12x32xf32>
    %119 = arith.addf %117, %118 : vector<12x32xf32>
    %120 = arith.negf %119 : vector<12x32xf32>
    %121 = math.exp %120 : vector<12x32xf32>
    %cst_45 = arith.constant 1.000000e+00 : f32
    %122 = vector.broadcast %cst_45 : f32 to vector<12x32xf32>
    %123 = arith.addf %122, %121 : vector<12x32xf32>
    %124 = arith.divf %122, %123 : vector<12x32xf32>
    %125 = arith.mulf %119, %124 : vector<12x32xf32>
    %126 = arith.truncf %125 : vector<12x32xf32> to vector<12x32xbf16>
    %c0_46 = arith.constant 0 : index
    %c0_47 = arith.constant 0 : index
    %127 = vector.load %arg9[%c0_46, %c0_47] : memref<32x16xbf16, #tpu.memory_space<vmem>>, vector<32x16xbf16>
    %cst_48 = arith.constant dense<0.000000e+00> : vector<12x16xf32>
    %128 = tpu.matmul %126, %127, %cst_48 {dimension_numbers = #tpu.dot_dimension_numbers<[1], [0], [0], [1], [0, 0, 1, 1], [], []>} : vector<12x32xbf16>, vector<32x16xbf16>, vector<12x16xf32> -> vector<12x16xf32>
    %c11 = arith.constant 11 : index
    %c0_49 = arith.constant 0 : index
    %129 = vector.load %arg5[%c11, %c0_49] : memref<28x128xf32, #tpu.memory_space<vmem>>, vector<1x16xf32>
    %130 = vector.broadcast %129 : vector<1x16xf32> to vector<12x16xf32>
    %131 = arith.addf %128, %130 : vector<12x16xf32>
    %132 = arith.negf %131 : vector<12x16xf32>
    %133 = math.exp %132 : vector<12x16xf32>
    %cst_50 = arith.constant 1.000000e+00 : f32
    %134 = vector.broadcast %cst_50 : f32 to vector<12x16xf32>
    %135 = arith.addf %134, %133 : vector<12x16xf32>
    %136 = arith.divf %134, %135 : vector<12x16xf32>
    %137 = arith.mulf %131, %136 : vector<12x16xf32>
    %c0_51 = arith.constant 0 : index
    %c0_52 = arith.constant 0 : index
    %138 = vector.load %arg1[%c0_51, %c0_52] : memref<48x1xi32, #tpu.memory_space<vmem>>, vector<48x1xi32>
    %c0_53 = arith.constant 0 : index
    %c0_54 = arith.constant 0 : index
    %139 = vector.load %arg2[%c0_53, %c0_54] : memref<1x24xi32, #tpu.memory_space<vmem>>, vector<1x24xi32>
    %140 = vector.extract_strided_slice %138 {offsets = [0, 0], sizes = [24, 1], strides = [1, 1]} : vector<48x1xi32> to vector<24x1xi32>
    %141 = vector.extract_strided_slice %138 {offsets = [24, 0], sizes = [24, 1], strides = [1, 1]} : vector<48x1xi32> to vector<24x1xi32>
    %142 = tpu.concatenate %140, %141 in 0 : vector<24x1xi32>, vector<24x1xi32> -> vector<48x1xi32>
    %143 = tpu.iota {dimensions = array<i32: 1>} : vector<48x12xi32>
    %144 = vector.broadcast %142 : vector<48x1xi32> to vector<48x12xi32>
    %145 = arith.cmpi eq, %144, %143 : vector<48x12xi32>
    %146 = arith.extui %145 : vector<48x12xi1> to vector<48x12xi32>
    %147 = arith.sitofp %146 : vector<48x12xi32> to vector<48x12xf32>
    %148 = arith.truncf %147 : vector<48x12xf32> to vector<48x12xbf16>
    %149 = tpu.iota {dimensions = array<i32: 0>} : vector<12x24xi32>
    %150 = vector.broadcast %139 : vector<1x24xi32> to vector<12x24xi32>
    %151 = arith.cmpi eq, %150, %149 : vector<12x24xi32>
    %152 = arith.extui %151 : vector<12x24xi1> to vector<12x24xi32>
    %153 = arith.sitofp %152 : vector<12x24xi32> to vector<12x24xf32>
    %154 = arith.truncf %153 : vector<12x24xf32> to vector<12x24xbf16>
    %c12 = arith.constant 12 : index
    %c0_55 = arith.constant 0 : index
    %155 = vector.load %arg5[%c12, %c0_55] : memref<28x128xf32, #tpu.memory_space<vmem>>, vector<1x32xf32>
    %c13 = arith.constant 13 : index
    %c0_56 = arith.constant 0 : index
    %156 = vector.load %arg5[%c13, %c0_56] : memref<28x128xf32, #tpu.memory_space<vmem>>, vector<1x8xf32>
    %c14 = arith.constant 14 : index
    %c0_57 = arith.constant 0 : index
    %157 = vector.load %arg5[%c14, %c0_57] : memref<28x128xf32, #tpu.memory_space<vmem>>, vector<1x24xf32>
    %c15 = arith.constant 15 : index
    %c0_58 = arith.constant 0 : index
    %158 = vector.load %arg5[%c15, %c0_58] : memref<28x128xf32, #tpu.memory_space<vmem>>, vector<1x24xf32>
    %c16 = arith.constant 16 : index
    %c0_59 = arith.constant 0 : index
    %159 = vector.load %arg5[%c16, %c0_59] : memref<28x128xf32, #tpu.memory_space<vmem>>, vector<1x32xf32>
    %c17 = arith.constant 17 : index
    %c0_60 = arith.constant 0 : index
    %160 = vector.load %arg5[%c17, %c0_60] : memref<28x128xf32, #tpu.memory_space<vmem>>, vector<1x32xf32>
    %c18 = arith.constant 18 : index
    %c0_61 = arith.constant 0 : index
    %161 = vector.load %arg5[%c18, %c0_61] : memref<28x128xf32, #tpu.memory_space<vmem>>, vector<1x16xf32>
    %c0_62 = arith.constant 0 : index
    %c0_63 = arith.constant 0 : index
    %c0_64 = arith.constant 0 : index
    %162 = vector.load %arg10[%c0_62, %c0_63, %c0_64] : memref<2x44x32xbf16, #tpu.memory_space<vmem>>, vector<1x44x32xbf16>
    %163 = vector.shape_cast %162 : vector<1x44x32xbf16> to vector<44x32xbf16>
    %c0_65 = arith.constant 0 : index
    %c0_66 = arith.constant 0 : index
    %c0_67 = arith.constant 0 : index
    %164 = vector.load %arg11[%c0_65, %c0_66, %c0_67] : memref<2x32x8xbf16, #tpu.memory_space<vmem>>, vector<1x32x8xbf16>
    %165 = vector.shape_cast %164 : vector<1x32x8xbf16> to vector<32x8xbf16>
    %c0_68 = arith.constant 0 : index
    %c0_69 = arith.constant 0 : index
    %c0_70 = arith.constant 0 : index
    %166 = vector.load %arg12[%c0_68, %c0_69, %c0_70] : memref<2x24x32xbf16, #tpu.memory_space<vmem>>, vector<1x24x32xbf16>
    %167 = vector.shape_cast %166 : vector<1x24x32xbf16> to vector<24x32xbf16>
    %c0_71 = arith.constant 0 : index
    %c0_72 = arith.constant 0 : index
    %c0_73 = arith.constant 0 : index
    %168 = vector.load %arg13[%c0_71, %c0_72, %c0_73] : memref<2x32x32xbf16, #tpu.memory_space<vmem>>, vector<1x32x32xbf16>
    %169 = vector.shape_cast %168 : vector<1x32x32xbf16> to vector<32x32xbf16>
    %c0_74 = arith.constant 0 : index
    %c0_75 = arith.constant 0 : index
    %c0_76 = arith.constant 0 : index
    %170 = vector.load %arg14[%c0_74, %c0_75, %c0_76] : memref<2x32x16xbf16, #tpu.memory_space<vmem>>, vector<1x32x16xbf16>
    %171 = vector.shape_cast %170 : vector<1x32x16xbf16> to vector<32x16xbf16>
    %172 = arith.truncf %137 : vector<12x16xf32> to vector<12x16xbf16>
    %cst_77 = arith.constant 0.000000e+00 : f32
    %173 = vector.broadcast %cst_77 : f32 to vector<12x8xf32>
    %cst_78 = arith.constant dense<0.000000e+00> : vector<48x16xf32>
    %174 = tpu.matmul %148, %172, %cst_78 {dimension_numbers = #tpu.dot_dimension_numbers<[1], [0], [0], [1], [0, 0, 1, 1], [], []>} : vector<48x12xbf16>, vector<12x16xbf16>, vector<48x16xf32> -> vector<48x16xf32>
    %175 = vector.extract_strided_slice %174 {offsets = [0, 0], sizes = [24, 16], strides = [1, 1]} : vector<48x16xf32> to vector<24x16xf32>
    %176 = vector.extract_strided_slice %174 {offsets = [24, 0], sizes = [24, 16], strides = [1, 1]} : vector<48x16xf32> to vector<24x16xf32>
    %177 = tpu.concatenate %68, %175, %176 in 1 : vector<24x12xf32>, vector<24x16xf32>, vector<24x16xf32> -> vector<24x44xf32>
    %178 = arith.truncf %177 : vector<24x44xf32> to vector<24x44xbf16>
    %cst_79 = arith.constant dense<0.000000e+00> : vector<24x32xf32>
    %179 = tpu.matmul %178, %163, %cst_79 {dimension_numbers = #tpu.dot_dimension_numbers<[1], [0], [0], [1], [0, 0, 1, 1], [], []>} : vector<24x44xbf16>, vector<44x32xbf16>, vector<24x32xf32> -> vector<24x32xf32>
    %180 = vector.broadcast %155 : vector<1x32xf32> to vector<24x32xf32>
    %181 = arith.addf %179, %180 : vector<24x32xf32>
    %182 = arith.negf %181 : vector<24x32xf32>
    %183 = math.exp %182 : vector<24x32xf32>
    %cst_80 = arith.constant 1.000000e+00 : f32
    %184 = vector.broadcast %cst_80 : f32 to vector<24x32xf32>
    %185 = arith.addf %184, %183 : vector<24x32xf32>
    %186 = arith.divf %184, %185 : vector<24x32xf32>
    %187 = arith.mulf %181, %186 : vector<24x32xf32>
    %188 = arith.truncf %187 : vector<24x32xf32> to vector<24x32xbf16>
    %cst_81 = arith.constant dense<0.000000e+00> : vector<24x8xf32>
    %189 = tpu.matmul %188, %165, %cst_81 {dimension_numbers = #tpu.dot_dimension_numbers<[1], [0], [0], [1], [0, 0, 1, 1], [], []>} : vector<24x32xbf16>, vector<32x8xbf16>, vector<24x8xf32> -> vector<24x8xf32>
    %190 = vector.broadcast %156 : vector<1x8xf32> to vector<24x8xf32>
    %191 = arith.addf %189, %190 : vector<24x8xf32>
    %192 = arith.negf %191 : vector<24x8xf32>
    %193 = math.exp %192 : vector<24x8xf32>
    %cst_82 = arith.constant 1.000000e+00 : f32
    %194 = vector.broadcast %cst_82 : f32 to vector<24x8xf32>
    %195 = arith.addf %194, %193 : vector<24x8xf32>
    %196 = arith.divf %194, %195 : vector<24x8xf32>
    %197 = arith.mulf %191, %196 : vector<24x8xf32>
    %198 = arith.truncf %197 : vector<24x8xf32> to vector<24x8xbf16>
    %cst_83 = arith.constant dense<0.000000e+00> : vector<12x8xf32>
    %199 = tpu.matmul %154, %198, %cst_83 {dimension_numbers = #tpu.dot_dimension_numbers<[1], [0], [0], [1], [0, 0, 1, 1], [], []>} : vector<12x24xbf16>, vector<24x8xbf16>, vector<12x8xf32> -> vector<12x8xf32>
    %200 = arith.addf %173, %199 : vector<12x8xf32>
    %201 = tpu.concatenate %200, %137 in 1 : vector<12x8xf32>, vector<12x16xf32> -> vector<12x24xf32>
    %cst_84 = arith.constant dense<0.000000e+00> : vector<24xf32>
    %202 = vector.multi_reduction <add>, %201, %cst_84 [0] : vector<12x24xf32> to vector<24xf32>
    %203 = vector.shape_cast %202 : vector<24xf32> to vector<1x24xf32>
    %cst_85 = arith.constant 1.200000e+01 : f32
    %204 = vector.broadcast %cst_85 : f32 to vector<1x24xf32>
    %205 = arith.divf %203, %204 : vector<1x24xf32>
    %206 = vector.broadcast %205 : vector<1x24xf32> to vector<12x24xf32>
    %207 = arith.subf %201, %206 : vector<12x24xf32>
    %208 = arith.mulf %207, %207 : vector<12x24xf32>
    %cst_86 = arith.constant dense<0.000000e+00> : vector<24xf32>
    %209 = vector.multi_reduction <add>, %208, %cst_86 [0] : vector<12x24xf32> to vector<24xf32>
    %210 = vector.shape_cast %209 : vector<24xf32> to vector<1x24xf32>
    %cst_87 = arith.constant 1.200000e+01 : f32
    %211 = vector.broadcast %cst_87 : f32 to vector<1x24xf32>
    %212 = arith.divf %210, %211 : vector<1x24xf32>
    %cst_88 = arith.constant 9.99999974E-6 : f32
    %213 = vector.broadcast %cst_88 : f32 to vector<1x24xf32>
    %214 = arith.addf %212, %213 : vector<1x24xf32>
    %215 = math.rsqrt %214 : vector<1x24xf32>
    %216 = vector.broadcast %215 : vector<1x24xf32> to vector<12x24xf32>
    %217 = arith.mulf %207, %216 : vector<12x24xf32>
    %218 = vector.broadcast %157 : vector<1x24xf32> to vector<12x24xf32>
    %219 = arith.mulf %217, %218 : vector<12x24xf32>
    %220 = vector.broadcast %158 : vector<1x24xf32> to vector<12x24xf32>
    %221 = arith.addf %219, %220 : vector<12x24xf32>
    %222 = arith.truncf %221 : vector<12x24xf32> to vector<12x24xbf16>
    %cst_89 = arith.constant dense<0.000000e+00> : vector<12x32xf32>
    %223 = tpu.matmul %222, %167, %cst_89 {dimension_numbers = #tpu.dot_dimension_numbers<[1], [0], [0], [1], [0, 0, 1, 1], [], []>} : vector<12x24xbf16>, vector<24x32xbf16>, vector<12x32xf32> -> vector<12x32xf32>
    %224 = vector.broadcast %159 : vector<1x32xf32> to vector<12x32xf32>
    %225 = arith.addf %223, %224 : vector<12x32xf32>
    %226 = arith.negf %225 : vector<12x32xf32>
    %227 = math.exp %226 : vector<12x32xf32>
    %cst_90 = arith.constant 1.000000e+00 : f32
    %228 = vector.broadcast %cst_90 : f32 to vector<12x32xf32>
    %229 = arith.addf %228, %227 : vector<12x32xf32>
    %230 = arith.divf %228, %229 : vector<12x32xf32>
    %231 = arith.mulf %225, %230 : vector<12x32xf32>
    %232 = arith.truncf %231 : vector<12x32xf32> to vector<12x32xbf16>
    %cst_91 = arith.constant dense<0.000000e+00> : vector<12x32xf32>
    %233 = tpu.matmul %232, %169, %cst_91 {dimension_numbers = #tpu.dot_dimension_numbers<[1], [0], [0], [1], [0, 0, 1, 1], [], []>} : vector<12x32xbf16>, vector<32x32xbf16>, vector<12x32xf32> -> vector<12x32xf32>
    %234 = vector.broadcast %160 : vector<1x32xf32> to vector<12x32xf32>
    %235 = arith.addf %233, %234 : vector<12x32xf32>
    %236 = arith.negf %235 : vector<12x32xf32>
    %237 = math.exp %236 : vector<12x32xf32>
    %cst_92 = arith.constant 1.000000e+00 : f32
    %238 = vector.broadcast %cst_92 : f32 to vector<12x32xf32>
    %239 = arith.addf %238, %237 : vector<12x32xf32>
    %240 = arith.divf %238, %239 : vector<12x32xf32>
    %241 = arith.mulf %235, %240 : vector<12x32xf32>
    %242 = arith.truncf %241 : vector<12x32xf32> to vector<12x32xbf16>
    %cst_93 = arith.constant dense<0.000000e+00> : vector<12x16xf32>
    %243 = tpu.matmul %242, %171, %cst_93 {dimension_numbers = #tpu.dot_dimension_numbers<[1], [0], [0], [1], [0, 0, 1, 1], [], []>} : vector<12x32xbf16>, vector<32x16xbf16>, vector<12x16xf32> -> vector<12x16xf32>
    %244 = vector.broadcast %161 : vector<1x16xf32> to vector<12x16xf32>
    %245 = arith.addf %243, %244 : vector<12x16xf32>
    %246 = arith.addf %137, %245 : vector<12x16xf32>
    %c19 = arith.constant 19 : index
    %c0_94 = arith.constant 0 : index
    %247 = vector.load %arg5[%c19, %c0_94] : memref<28x128xf32, #tpu.memory_space<vmem>>, vector<1x32xf32>
    %c20 = arith.constant 20 : index
    %c0_95 = arith.constant 0 : index
    %248 = vector.load %arg5[%c20, %c0_95] : memref<28x128xf32, #tpu.memory_space<vmem>>, vector<1x8xf32>
    %c21 = arith.constant 21 : index
    %c0_96 = arith.constant 0 : index
    %249 = vector.load %arg5[%c21, %c0_96] : memref<28x128xf32, #tpu.memory_space<vmem>>, vector<1x24xf32>
    %c22 = arith.constant 22 : index
    %c0_97 = arith.constant 0 : index
    %250 = vector.load %arg5[%c22, %c0_97] : memref<28x128xf32, #tpu.memory_space<vmem>>, vector<1x24xf32>
    %c23 = arith.constant 23 : index
    %c0_98 = arith.constant 0 : index
    %251 = vector.load %arg5[%c23, %c0_98] : memref<28x128xf32, #tpu.memory_space<vmem>>, vector<1x32xf32>
    %c24 = arith.constant 24 : index
    %c0_99 = arith.constant 0 : index
    %252 = vector.load %arg5[%c24, %c0_99] : memref<28x128xf32, #tpu.memory_space<vmem>>, vector<1x32xf32>
    %c25 = arith.constant 25 : index
    %c0_100 = arith.constant 0 : index
    %253 = vector.load %arg5[%c25, %c0_100] : memref<28x128xf32, #tpu.memory_space<vmem>>, vector<1x16xf32>
    %c1_101 = arith.constant 1 : index
    %c0_102 = arith.constant 0 : index
    %c0_103 = arith.constant 0 : index
    %254 = vector.load %arg10[%c1_101, %c0_102, %c0_103] : memref<2x44x32xbf16, #tpu.memory_space<vmem>>, vector<1x44x32xbf16>
    %255 = vector.shape_cast %254 : vector<1x44x32xbf16> to vector<44x32xbf16>
    %c1_104 = arith.constant 1 : index
    %c0_105 = arith.constant 0 : index
    %c0_106 = arith.constant 0 : index
    %256 = vector.load %arg11[%c1_104, %c0_105, %c0_106] : memref<2x32x8xbf16, #tpu.memory_space<vmem>>, vector<1x32x8xbf16>
    %257 = vector.shape_cast %256 : vector<1x32x8xbf16> to vector<32x8xbf16>
    %c1_107 = arith.constant 1 : index
    %c0_108 = arith.constant 0 : index
    %c0_109 = arith.constant 0 : index
    %258 = vector.load %arg12[%c1_107, %c0_108, %c0_109] : memref<2x24x32xbf16, #tpu.memory_space<vmem>>, vector<1x24x32xbf16>
    %259 = vector.shape_cast %258 : vector<1x24x32xbf16> to vector<24x32xbf16>
    %c1_110 = arith.constant 1 : index
    %c0_111 = arith.constant 0 : index
    %c0_112 = arith.constant 0 : index
    %260 = vector.load %arg13[%c1_110, %c0_111, %c0_112] : memref<2x32x32xbf16, #tpu.memory_space<vmem>>, vector<1x32x32xbf16>
    %261 = vector.shape_cast %260 : vector<1x32x32xbf16> to vector<32x32xbf16>
    %c1_113 = arith.constant 1 : index
    %c0_114 = arith.constant 0 : index
    %c0_115 = arith.constant 0 : index
    %262 = vector.load %arg14[%c1_113, %c0_114, %c0_115] : memref<2x32x16xbf16, #tpu.memory_space<vmem>>, vector<1x32x16xbf16>
    %263 = vector.shape_cast %262 : vector<1x32x16xbf16> to vector<32x16xbf16>
    %264 = arith.truncf %246 : vector<12x16xf32> to vector<12x16xbf16>
    %cst_116 = arith.constant 0.000000e+00 : f32
    %265 = vector.broadcast %cst_116 : f32 to vector<12x8xf32>
    %cst_117 = arith.constant dense<0.000000e+00> : vector<48x16xf32>
    %266 = tpu.matmul %148, %264, %cst_117 {dimension_numbers = #tpu.dot_dimension_numbers<[1], [0], [0], [1], [0, 0, 1, 1], [], []>} : vector<48x12xbf16>, vector<12x16xbf16>, vector<48x16xf32> -> vector<48x16xf32>
    %267 = vector.extract_strided_slice %266 {offsets = [0, 0], sizes = [24, 16], strides = [1, 1]} : vector<48x16xf32> to vector<24x16xf32>
    %268 = vector.extract_strided_slice %266 {offsets = [24, 0], sizes = [24, 16], strides = [1, 1]} : vector<48x16xf32> to vector<24x16xf32>
    %269 = tpu.concatenate %68, %267, %268 in 1 : vector<24x12xf32>, vector<24x16xf32>, vector<24x16xf32> -> vector<24x44xf32>
    %270 = arith.truncf %269 : vector<24x44xf32> to vector<24x44xbf16>
    %cst_118 = arith.constant dense<0.000000e+00> : vector<24x32xf32>
    %271 = tpu.matmul %270, %255, %cst_118 {dimension_numbers = #tpu.dot_dimension_numbers<[1], [0], [0], [1], [0, 0, 1, 1], [], []>} : vector<24x44xbf16>, vector<44x32xbf16>, vector<24x32xf32> -> vector<24x32xf32>
    %272 = vector.broadcast %247 : vector<1x32xf32> to vector<24x32xf32>
    %273 = arith.addf %271, %272 : vector<24x32xf32>
    %274 = arith.negf %273 : vector<24x32xf32>
    %275 = math.exp %274 : vector<24x32xf32>
    %cst_119 = arith.constant 1.000000e+00 : f32
    %276 = vector.broadcast %cst_119 : f32 to vector<24x32xf32>
    %277 = arith.addf %276, %275 : vector<24x32xf32>
    %278 = arith.divf %276, %277 : vector<24x32xf32>
    %279 = arith.mulf %273, %278 : vector<24x32xf32>
    %280 = arith.truncf %279 : vector<24x32xf32> to vector<24x32xbf16>
    %cst_120 = arith.constant dense<0.000000e+00> : vector<24x8xf32>
    %281 = tpu.matmul %280, %257, %cst_120 {dimension_numbers = #tpu.dot_dimension_numbers<[1], [0], [0], [1], [0, 0, 1, 1], [], []>} : vector<24x32xbf16>, vector<32x8xbf16>, vector<24x8xf32> -> vector<24x8xf32>
    %282 = vector.broadcast %248 : vector<1x8xf32> to vector<24x8xf32>
    %283 = arith.addf %281, %282 : vector<24x8xf32>
    %284 = arith.negf %283 : vector<24x8xf32>
    %285 = math.exp %284 : vector<24x8xf32>
    %cst_121 = arith.constant 1.000000e+00 : f32
    %286 = vector.broadcast %cst_121 : f32 to vector<24x8xf32>
    %287 = arith.addf %286, %285 : vector<24x8xf32>
    %288 = arith.divf %286, %287 : vector<24x8xf32>
    %289 = arith.mulf %283, %288 : vector<24x8xf32>
    %290 = arith.truncf %289 : vector<24x8xf32> to vector<24x8xbf16>
    %cst_122 = arith.constant dense<0.000000e+00> : vector<12x8xf32>
    %291 = tpu.matmul %154, %290, %cst_122 {dimension_numbers = #tpu.dot_dimension_numbers<[1], [0], [0], [1], [0, 0, 1, 1], [], []>} : vector<12x24xbf16>, vector<24x8xbf16>, vector<12x8xf32> -> vector<12x8xf32>
    %292 = arith.addf %265, %291 : vector<12x8xf32>
    %293 = tpu.concatenate %292, %246 in 1 : vector<12x8xf32>, vector<12x16xf32> -> vector<12x24xf32>
    %cst_123 = arith.constant dense<0.000000e+00> : vector<24xf32>
    %294 = vector.multi_reduction <add>, %293, %cst_123 [0] : vector<12x24xf32> to vector<24xf32>
    %295 = vector.shape_cast %294 : vector<24xf32> to vector<1x24xf32>
    %cst_124 = arith.constant 1.200000e+01 : f32
    %296 = vector.broadcast %cst_124 : f32 to vector<1x24xf32>
    %297 = arith.divf %295, %296 : vector<1x24xf32>
    %298 = vector.broadcast %297 : vector<1x24xf32> to vector<12x24xf32>
    %299 = arith.subf %293, %298 : vector<12x24xf32>
    %300 = arith.mulf %299, %299 : vector<12x24xf32>
    %cst_125 = arith.constant dense<0.000000e+00> : vector<24xf32>
    %301 = vector.multi_reduction <add>, %300, %cst_125 [0] : vector<12x24xf32> to vector<24xf32>
    %302 = vector.shape_cast %301 : vector<24xf32> to vector<1x24xf32>
    %cst_126 = arith.constant 1.200000e+01 : f32
    %303 = vector.broadcast %cst_126 : f32 to vector<1x24xf32>
    %304 = arith.divf %302, %303 : vector<1x24xf32>
    %cst_127 = arith.constant 9.99999974E-6 : f32
    %305 = vector.broadcast %cst_127 : f32 to vector<1x24xf32>
    %306 = arith.addf %304, %305 : vector<1x24xf32>
    %307 = math.rsqrt %306 : vector<1x24xf32>
    %308 = vector.broadcast %307 : vector<1x24xf32> to vector<12x24xf32>
    %309 = arith.mulf %299, %308 : vector<12x24xf32>
    %310 = vector.broadcast %249 : vector<1x24xf32> to vector<12x24xf32>
    %311 = arith.mulf %309, %310 : vector<12x24xf32>
    %312 = vector.broadcast %250 : vector<1x24xf32> to vector<12x24xf32>
    %313 = arith.addf %311, %312 : vector<12x24xf32>
    %314 = arith.truncf %313 : vector<12x24xf32> to vector<12x24xbf16>
    %cst_128 = arith.constant dense<0.000000e+00> : vector<12x32xf32>
    %315 = tpu.matmul %314, %259, %cst_128 {dimension_numbers = #tpu.dot_dimension_numbers<[1], [0], [0], [1], [0, 0, 1, 1], [], []>} : vector<12x24xbf16>, vector<24x32xbf16>, vector<12x32xf32> -> vector<12x32xf32>
    %316 = vector.broadcast %251 : vector<1x32xf32> to vector<12x32xf32>
    %317 = arith.addf %315, %316 : vector<12x32xf32>
    %318 = arith.negf %317 : vector<12x32xf32>
    %319 = math.exp %318 : vector<12x32xf32>
    %cst_129 = arith.constant 1.000000e+00 : f32
    %320 = vector.broadcast %cst_129 : f32 to vector<12x32xf32>
    %321 = arith.addf %320, %319 : vector<12x32xf32>
    %322 = arith.divf %320, %321 : vector<12x32xf32>
    %323 = arith.mulf %317, %322 : vector<12x32xf32>
    %324 = arith.truncf %323 : vector<12x32xf32> to vector<12x32xbf16>
    %cst_130 = arith.constant dense<0.000000e+00> : vector<12x32xf32>
    %325 = tpu.matmul %324, %261, %cst_130 {dimension_numbers = #tpu.dot_dimension_numbers<[1], [0], [0], [1], [0, 0, 1, 1], [], []>} : vector<12x32xbf16>, vector<32x32xbf16>, vector<12x32xf32> -> vector<12x32xf32>
    %326 = vector.broadcast %252 : vector<1x32xf32> to vector<12x32xf32>
    %327 = arith.addf %325, %326 : vector<12x32xf32>
    %328 = arith.negf %327 : vector<12x32xf32>
    %329 = math.exp %328 : vector<12x32xf32>
    %cst_131 = arith.constant 1.000000e+00 : f32
    %330 = vector.broadcast %cst_131 : f32 to vector<12x32xf32>
    %331 = arith.addf %330, %329 : vector<12x32xf32>
    %332 = arith.divf %330, %331 : vector<12x32xf32>
    %333 = arith.mulf %327, %332 : vector<12x32xf32>
    %334 = arith.truncf %333 : vector<12x32xf32> to vector<12x32xbf16>
    %cst_132 = arith.constant dense<0.000000e+00> : vector<12x16xf32>
    %335 = tpu.matmul %334, %263, %cst_132 {dimension_numbers = #tpu.dot_dimension_numbers<[1], [0], [0], [1], [0, 0, 1, 1], [], []>} : vector<12x32xbf16>, vector<32x16xbf16>, vector<12x16xf32> -> vector<12x16xf32>
    %336 = vector.broadcast %253 : vector<1x16xf32> to vector<12x16xf32>
    %337 = arith.addf %335, %336 : vector<12x16xf32>
    %338 = arith.addf %246, %337 : vector<12x16xf32>
    %339 = arith.truncf %338 : vector<12x16xf32> to vector<12x16xbf16>
    %c0_133 = arith.constant 0 : index
    %c0_134 = arith.constant 0 : index
    %340 = vector.load %arg15[%c0_133, %c0_134] : memref<16x64xbf16, #tpu.memory_space<vmem>>, vector<16x64xbf16>
    %cst_135 = arith.constant dense<0.000000e+00> : vector<12x64xf32>
    %341 = tpu.matmul %339, %340, %cst_135 {dimension_numbers = #tpu.dot_dimension_numbers<[1], [0], [0], [1], [0, 0, 1, 1], [], []>} : vector<12x16xbf16>, vector<16x64xbf16>, vector<12x64xf32> -> vector<12x64xf32>
    %c26 = arith.constant 26 : index
    %c0_136 = arith.constant 0 : index
    %342 = vector.load %arg5[%c26, %c0_136] : memref<28x128xf32, #tpu.memory_space<vmem>>, vector<1x64xf32>
    %343 = vector.broadcast %342 : vector<1x64xf32> to vector<12x64xf32>
    %344 = arith.addf %341, %343 : vector<12x64xf32>
    %345 = arith.negf %344 : vector<12x64xf32>
    %346 = math.exp %345 : vector<12x64xf32>
    %cst_137 = arith.constant 1.000000e+00 : f32
    %347 = vector.broadcast %cst_137 : f32 to vector<12x64xf32>
    %348 = arith.addf %347, %346 : vector<12x64xf32>
    %349 = arith.divf %347, %348 : vector<12x64xf32>
    %350 = arith.mulf %344, %349 : vector<12x64xf32>
    %351 = arith.truncf %350 : vector<12x64xf32> to vector<12x64xbf16>
    %c0_138 = arith.constant 0 : index
    %c0_139 = arith.constant 0 : index
    %352 = vector.load %arg16[%c0_138, %c0_139] : memref<64x3xbf16, #tpu.memory_space<vmem>>, vector<64x3xbf16>
    %cst_140 = arith.constant dense<0.000000e+00> : vector<12x3xf32>
    %353 = tpu.matmul %351, %352, %cst_140 {dimension_numbers = #tpu.dot_dimension_numbers<[1], [0], [0], [1], [0, 0, 1, 1], [], []>} : vector<12x64xbf16>, vector<64x3xbf16>, vector<12x3xf32> -> vector<12x3xf32>
    %c27 = arith.constant 27 : index
    %c0_141 = arith.constant 0 : index
    %354 = vector.load %arg5[%c27, %c0_141] : memref<28x128xf32, #tpu.memory_space<vmem>>, vector<1x3xf32>
    %355 = vector.broadcast %354 : vector<1x3xf32> to vector<12x3xf32>
    %356 = arith.addf %353, %355 : vector<12x3xf32>
    %357 = tpu.iota {dimensions = array<i32: 1>} : vector<12x3xi32>
    %c2_i32 = arith.constant 2 : i32
    %358 = vector.broadcast %c2_i32 : i32 to vector<12x3xi32>
    %359 = arith.cmpi eq, %357, %358 : vector<12x3xi32>
    %360 = arith.negf %356 : vector<12x3xf32>
    %361 = math.exp %360 : vector<12x3xf32>
    %cst_142 = arith.constant 1.000000e+00 : f32
    %362 = vector.broadcast %cst_142 : f32 to vector<12x3xf32>
    %363 = arith.addf %362, %361 : vector<12x3xf32>
    %364 = arith.divf %362, %363 : vector<12x3xf32>
    %365 = arith.select %359, %364, %356 : vector<12x3xi1>, vector<12x3xf32>
    %cst_143 = arith.constant 0.000000e+00 : f32
    %366 = vector.broadcast %cst_143 : f32 to vector<12x125xf32>
    %367 = tpu.concatenate %365, %366 in 1 : vector<12x3xf32>, vector<12x125xf32> -> vector<12x128xf32>
    %c0_144 = arith.constant 0 : index
    %c0_145 = arith.constant 0 : index
    %368 = vector.load %arg17[%c0_144, %c0_145] : memref<12x128xf32, #tpu.memory_space<vmem>>, vector<12x128xf32>
    tpu.vector_store %arg17[%c0_144, %c0_145], %367 {strides = array<i32>} : memref<12x128xf32, #tpu.memory_space<vmem>>, vector<12x128xf32>,
    return
  }
  func.func @transform_0(%arg0: i32) -> (i32, i32) {
    %c0_i32 = arith.constant 0 : i32
    %c0_i32_0 = arith.constant 0 : i32
    %c0_i32_1 = arith.constant 0 : i32
    return %c0_i32, %c0_i32_0 : i32, i32
  }
  func.func @transform_1(%arg0: i32) -> (i32, i32) {
    %c0_i32 = arith.constant 0 : i32
    %c0_i32_0 = arith.constant 0 : i32
    %c0_i32_1 = arith.constant 0 : i32
    return %c0_i32, %c0_i32_0 : i32, i32
  }
  func.func @transform_2(%arg0: i32) -> (i32, i32) {
    %c0_i32 = arith.constant 0 : i32
    %c0_i32_0 = arith.constant 0 : i32
    %c0_i32_1 = arith.constant 0 : i32
    return %c0_i32, %c0_i32_0 : i32, i32
  }
  func.func @transform_3(%arg0: i32) -> (i32, i32) {
    %c0_i32 = arith.constant 0 : i32
    %c0_i32_0 = arith.constant 0 : i32
    %c0_i32_1 = arith.constant 0 : i32
    return %c0_i32, %c0_i32_0 : i32, i32
  }
  func.func @transform_4(%arg0: i32) -> (i32, i32) {
    %c0_i32 = arith.constant 0 : i32
    %c0_i32_0 = arith.constant 0 : i32
    %c0_i32_1 = arith.constant 0 : i32
    return %c0_i32, %c0_i32_0 : i32, i32
  }
  func.func @transform_5(%arg0: i32) -> (i32, i32) {
    %c0_i32 = arith.constant 0 : i32
    %c0_i32_0 = arith.constant 0 : i32
    %c0_i32_1 = arith.constant 0 : i32
    return %c0_i32, %c0_i32_0 : i32, i32
  }
  func.func @transform_6(%arg0: i32) -> (i32, i32) {
    %c0_i32 = arith.constant 0 : i32
    %c0_i32_0 = arith.constant 0 : i32
    %c0_i32_1 = arith.constant 0 : i32
    return %c0_i32, %c0_i32_0 : i32, i32
  }
  func.func @transform_7(%arg0: i32) -> (i32, i32) {
    %c0_i32 = arith.constant 0 : i32
    %c0_i32_0 = arith.constant 0 : i32
    %c0_i32_1 = arith.constant 0 : i32
    return %c0_i32, %c0_i32_0 : i32, i32
  }
  func.func @transform_8(%arg0: i32) -> (i32, i32) {
    %c0_i32 = arith.constant 0 : i32
    %c0_i32_0 = arith.constant 0 : i32
    %c0_i32_1 = arith.constant 0 : i32
    return %c0_i32, %c0_i32_0 : i32, i32
  }
  func.func @transform_9(%arg0: i32) -> (i32, i32, i32) {
    %c0_i32 = arith.constant 0 : i32
    %c0_i32_0 = arith.constant 0 : i32
    %c0_i32_1 = arith.constant 0 : i32
    %c0_i32_2 = arith.constant 0 : i32
    return %c0_i32, %c0_i32_0, %c0_i32_1 : i32, i32, i32
  }
  func.func @transform_10(%arg0: i32) -> (i32, i32, i32) {
    %c0_i32 = arith.constant 0 : i32
    %c0_i32_0 = arith.constant 0 : i32
    %c0_i32_1 = arith.constant 0 : i32
    %c0_i32_2 = arith.constant 0 : i32
    return %c0_i32, %c0_i32_0, %c0_i32_1 : i32, i32, i32
  }
  func.func @transform_11(%arg0: i32) -> (i32, i32, i32) {
    %c0_i32 = arith.constant 0 : i32
    %c0_i32_0 = arith.constant 0 : i32
    %c0_i32_1 = arith.constant 0 : i32
    %c0_i32_2 = arith.constant 0 : i32
    return %c0_i32, %c0_i32_0, %c0_i32_1 : i32, i32, i32
  }
  func.func @transform_12(%arg0: i32) -> (i32, i32, i32) {
    %c0_i32 = arith.constant 0 : i32
    %c0_i32_0 = arith.constant 0 : i32
    %c0_i32_1 = arith.constant 0 : i32
    %c0_i32_2 = arith.constant 0 : i32
    return %c0_i32, %c0_i32_0, %c0_i32_1 : i32, i32, i32
  }
  func.func @transform_13(%arg0: i32) -> (i32, i32, i32) {
    %c0_i32 = arith.constant 0 : i32
    %c0_i32_0 = arith.constant 0 : i32
    %c0_i32_1 = arith.constant 0 : i32
    %c0_i32_2 = arith.constant 0 : i32
    return %c0_i32, %c0_i32_0, %c0_i32_1 : i32, i32, i32
  }
  func.func @transform_14(%arg0: i32) -> (i32, i32) {
    %c0_i32 = arith.constant 0 : i32
    %c0_i32_0 = arith.constant 0 : i32
    %c0_i32_1 = arith.constant 0 : i32
    return %c0_i32, %c0_i32_0 : i32, i32
  }
  func.func @transform_15(%arg0: i32) -> (i32, i32) {
    %c0_i32 = arith.constant 0 : i32
    %c0_i32_0 = arith.constant 0 : i32
    %c0_i32_1 = arith.constant 0 : i32
    return %c0_i32, %c0_i32_0 : i32, i32
  }
  func.func @transform_16(%arg0: i32) -> (i32, i32) {
    %c0_i32 = arith.constant 0 : i32
    %c0_i32_0 = arith.constant 0 : i32
    %c0_i32_1 = arith.constant 0 : i32
    return %c0_i32, %c0_i32_0 : i32, i32
  }
}

</mosaic_0001>

<bundles_post_ra>
// kernel: _lambda_.1
= control target key start
LH: loop header
LB: loop body
LE: loop exit
PB: predicated region body
PF: predicated region fallthrough
CT: control target
= control target key end

     0   :  { %vm410_vm0 = vcmask 1044480   ;;  %vm351_vm1 = vcmask 80896   ;;  %v2711_v0 = vmov 0.0   ;;  %vm2712_vm2 = vmmov 0   ;;  %s2714_s26 = smov 12   ;;  %s2716_s27 = smov 8   ;;  %s3259_s7 = inlined_call_operand.vmem [shape: bf16[10,32], index: 7, kind: input, shape index: {}]   ;;  %s3260_s3 = inlined_call_operand.vmem [shape: f32[12,10], index: 3, kind: input, shape index: {}]   ;;  %s3261_s5 = inlined_call_operand.vmem [shape: bf16[6,32], index: 5, kind: input, shape index: {}]   ;;  %s3262_s2 = inlined_call_operand.vmem [shape: f32[24,6], index: 2, kind: input, shape index: {}]   ;;  %s3263_s4 = inlined_call_operand.vmem [shape: f32[28,128], index: 4, kind: input, shape index: {}]   ;;  %s3264_s6 = inlined_call_operand.vmem [shape: bf16[32,12], index: 6, kind: input, shape index: {}]   ;;  %s3265_s8 = inlined_call_operand.vmem [shape: bf16[32,16], index: 8, kind: input, shape index: {}]   ;;  %s3266_s0 = inlined_call_operand.vmem [shape: s32[48,1], index: 0, kind: input, shape index: {}]   ;;  %s3267_s9 = inlined_call_operand.vmem [shape: bf16[2,44,32], index: 9, kind: input, shape index: {}]   ;;  %s3268_s10 = inlined_call_operand.vmem [shape: bf16[2,32,8], index: 10, kind: input, shape index: {}]   ;;  %s3269_s1 = inlined_call_operand.vmem [shape: s32[1,24], index: 1, kind: input, shape index: {}]   ;;  %s3270_s11 = inlined_call_operand.vmem [shape: bf16[2,24,32], index: 11, kind: input, shape index: {}]   ;;  %s3271_s12 = inlined_call_operand.vmem [shape: bf16[2,32,32], index: 12, kind: input, shape index: {}]   ;;  %s3272_s13 = inlined_call_operand.vmem [shape: bf16[2,32,16], index: 13, kind: input, shape index: {}]   ;;  %s3273_s14 = inlined_call_operand.vmem [shape: bf16[16,64], index: 14, kind: input, shape index: {}]   ;;  %s3274_s15 = inlined_call_operand.vmem [shape: bf16[64,3], index: 15, kind: input, shape index: {}]   ;;  %s3275_s16 = inlined_call_operand.vmem [shape: f32[12,128], index: 16, kind: output, shape index: {}]  }
   0x1   :  { %3276 = sst [smem:[#allocation2_spill]] %s3259_s7  ;;  %2340 = vmatprep.subr.bf16.mxu0 %v2711_v0  ;;  %2342 = vmatprep.mubr.msk.bf16.mxu0 %vm2712_vm2, %v2711_v0  ;;  %v347_v2 = vld [vmem:[%s3260_s3] sm:$0xff]  ;;  %v348_v3 = vld [vmem:[%s3260_s3 + $0x8] sm:$0xf]  ;;  %vm353_vm3 = vcmask 76800   ;;  %vm124_vm4 = vcmask 1042432  }
   0x2   :  { %s3277_s23 = sld [smem:[#allocation2_spill]]  ;;  %v352_v5 = vsel %vm351_vm1, %v347_v2, 0.0  ;;  %v354_v6 = vsel %vm353_vm3, %v348_v3, 0.0  ;;  %v112_v8 = vld [vmem:[%s3261_s5] sm:$0x7]  ;;  %v55_v10 = vld [vmem:[%s3262_s2 + $0x8] sm:$0xff] }
   0x3   :  { %v355_v7 = vadd.f32 %v354_v6, %v352_v5  ;;  %v54_v9 = vld [vmem:[%s3262_s2] sm:$0xff]  ;;  %vm59_vm5 = vcmask 48128   ;;  %2500 = vmatprep.subr.msk.bf16.mxu1 %vm124_vm4, %v112_v8  ;;  %v126_v11 = vsel %vm124_vm4, %v112_v8, 0  ;;  %v56_v12 = vld [vmem:[%s3262_s2 + $0x10] sm:$0xff]  ;;  %vm178_vm6 = vcmask 261120  }
   0x4   :  { %2327 = vmatpush3.bf16.msra.mxu1 %v126_v11  ;;  %v60_v14 = vsel %vm59_vm5, %v54_v9, 0.0  ;;  %v61_v15 = vsel %vm59_vm5, %v55_v10, 0.0  ;;  %v63_v16 = vsel %vm59_vm5, %v56_v12, 0.0  ;;  %vm458_vm7 = vcmask 257024  }
   0x5   :  { %v356_v13 = vrot.slane %v355_v7, 4  ;;  %v62_v17 = vadd.f32 %v61_v15, %v60_v14  ;;  %v2103_v14 = vld [vmem:[%s3263_s4] ss:$0 sm:$0xff]  ;;  %vm693_vm10 = vcmask 1045504   ;;  %vm683_vm11 = vcmask 97280  }
   0x7   :  { %v357_v18 = vadd.f32 %v356_v13, %v355_v7  ;;  %v64_v19 = vadd.f32 %v63_v16, %v62_v17  ;;  %v2122_v7 = vld [vmem:[%s3263_s4 + $0x7] ss:$0 sm:$0xff] }
   0x8   :  { %v2531_v1 = vld [vmem:[%s3277_s23] sm:$0x1f]  }
   0x9   :  { %v412_v4 = vsel %vm410_vm0, %v2531_v1, 0  ;;  %v358_v20 = vrot.slane %v357_v18, 2  ;;  %v65_v21 = vrot.slane %v64_v19, 4  ;;  %vm781_vm0 = vcmask 228352  }
   0xa   :  { %2341 = vmatpush3.bf16.msra.mxu0 %v412_v4  ;;  %v2121_v4 = vld [vmem:[%s3263_s4 + $0x6] ss:$0 sm:$0xff] }
   0xb   :  { %2354 = vmatprep.subr.bf16.mxu0 %v2711_v0  ;;  %v359_v22 = vadd.f32 %v358_v20, %v357_v18  ;;  %v66_v23 = vadd.f32 %v65_v21, %v64_v19  ;;  %v2104_v18 = vld [vmem:[%s3263_s4 + $0x1] ss:$0 sm:$0xff] }
   0xd   :  { %v360_v24 = vrot.slane %v359_v22, 1  ;;  %v67_v25 = vrot.slane %v66_v23, 2 }
   0xf   :  { %v361_v26 = vadd.f32 %v360_v24, %v359_v22  ;;  %v68_v27 = vadd.f32 %v67_v25, %v66_v23 }
  0x11   :  { %v363_v28 = vmul.f32 0.083333336, %v361_v26  ;;  %v69_v29 = vrot.slane %v68_v27, 1 }
  0x13   :  { %v364_v30 = vsub.f32 %v347_v2, %v363_v28  ;;  %v365_v31 = vsub.f32 %v348_v3, %v363_v28  ;;  %v70_v32 = vadd.f32 %v69_v29, %v68_v27  ;;  %v2532_v27 = vld [vmem:[%s3264_s6 + $0x8] sm:$0xff]   ;;  %v2533_v28 = vld [vmem:[%s3264_s6] sm:$0xff]  }
  0x14   :  { %2332 = vmatprep.subr.bf16.mxu1 %v2532_v27  ;;  %v2123_v29 = vld [vmem:[%s3263_s4 + $0x8] ss:$0 sm:$0xff] }
  0x15   :  { %v366_v33 = vmul.f32 %v364_v30, %v364_v30  ;;  %v367_v34 = vmul.f32 %v365_v31, %v365_v31  ;;  %v72_v35 = vmul.f32 0.041666668, %v70_v32 }
  0x17   :  { %v368_v36 = vsel %vm351_vm1, %v366_v33, 0.0  ;;  %v369_v37 = vsel %vm353_vm3, %v367_v34, 0.0  ;;  %v73_v39 = vsub.f32 %v54_v9, %v72_v35  ;;  %v74_v40 = vsub.f32 %v55_v10, %v72_v35  ;;  %v594_v34 = vld [vmem:[%s3266_s0 + $0x10] sm:$0xff] }
  0x18   :  { %v370_v38 = vadd.f32 %v369_v37, %v368_v36  ;;  %v75_v41 = vsub.f32 %v56_v12, %v72_v35  ;;  %v2713_v33 = vmov 0   ;;  %v592_v35 = vld [vmem:[%s3266_s0] sm:$0xff]  ;;  %vm986_vm3 = vcmask 1043456  }
  0x19   :  { %v76_v43 = vmul.f32 %v73_v39, %v73_v39  ;;  %v77_v44 = vmul.f32 %v74_v40, %v74_v40  ;;  %2510 = vset.pattern.permute.xlu1 %v2713_v33  ;;  %2509 = vset.pattern.permute.xlu0 %v2713_v33 }
  0x1a   :  { %v371_v42 = vrot.slane %v370_v38, 4  ;;  %v78_v45 = vmul.f32 %v75_v41, %v75_v41  ;;  %608 = vperm.xlu1 %2510, %v594_v34   ;;  %602 = vperm.xlu0 %2509, %v592_v35  }
  0x1b   :  { %v79_v47 = vsel %vm59_vm5, %v76_v43, 0.0  ;;  %v80_v48 = vsel %vm59_vm5, %v77_v44, 0.0 }
  0x1c   :  { %v372_v46 = vadd.f32 %v371_v42, %v370_v38  ;;  %v82_v49 = vsel %vm59_vm5, %v78_v45, 0.0  ;;  %v81_v50 = vadd.f32 %v80_v48, %v79_v47  ;;  %v597_v45 = vld [vmem:[%s3266_s0 + $0x28] sm:$0xff] }
  0x1e   :  { %v373_v51 = vrot.slane %v372_v46, 2  ;;  %v83_v52 = vadd.f32 %v82_v49, %v81_v50  ;;  %v2105_v50 = vld [vmem:[%s3263_s4 + $0x2] ss:$0 sm:$0xff] }
  0x20   :  { %v374_v53 = vadd.f32 %v373_v51, %v372_v46  ;;  %v84_v54 = vrot.slane %v83_v52, 4  ;;  %v596_v46 = vld [vmem:[%s3266_s0 + $0x20] sm:$0xff] }
  0x22   :  { %v375_v55 = vrot.slane %v374_v53, 1  ;;  %v85_v56 = vadd.f32 %v84_v54, %v83_v52 }
  0x24   :  { %v376_v57 = vadd.f32 %v375_v55, %v374_v53  ;;  %v86_v58 = vrot.slane %v85_v56, 2 }
  0x26   :  { %v377_v59 = vmul.f32 0.083333336, %v376_v57  ;;  %v87_v60 = vadd.f32 %v86_v58, %v85_v56 }
  0x28   :  { %v378_v61 = vadd.f32 1e-05, %v377_v59  ;;  %v88_v62 = vrot.slane %v87_v60, 1 }
  0x2a   :  { %2563 = vrsqrt.f32 %v378_v61  ;;  %v89_v63 = vadd.f32 %v88_v62, %v87_v60 }
  0x2c   :  { %v90_v1 = vmul.f32 0.041666668, %v89_v63 }
  0x2e   :  { %v91_v2 = vadd.f32 1e-05, %v90_v1 }
  0x30   :  { %2565 = vrsqrt.f32 %v91_v2 }
  0x37   :  { %v2564_v3 = vpop.eup %2563 }
  0x38   :  { %v380_v5 = vmul.f32 %v2564_v3, %v364_v30  ;;  %v381_v6 = vmul.f32 %v2564_v3, %v365_v31 }
  0x3a   :  { %v386_v8 = vmul.f32 %v2121_v4, %v380_v5  ;;  %v387_v9 = vmul.f32 %v2121_v4, %v381_v6 }
  0x3c   :  { %v392_v10 = vadd.f32 %v2122_v7, %v386_v8  ;;  %v393_v11 = vadd.f32 %v2122_v7, %v387_v9 }
  0x3d   :  { %v2566_v12 = vpop.eup %2565 }
  0x3e   :  { %v394_v13 = vpack.c.bf16 %v393_v11, %v392_v10  ;;  %v93_v15 = vmul.f32 %v2566_v12, %v73_v39  ;;  %v94_v16 = vmul.f32 %v2566_v12, %v74_v40  ;;  %v95_v17 = vmul.f32 %v2566_v12, %v75_v41  ;;  %v595_v39 = vld [vmem:[%s3266_s0 + $0x18] sm:$0xff]  ;;  %v593_v40 = vld [vmem:[%s3266_s0 + $0x8] sm:$0xff]  ;;  %s2715_s0 = smov 28  }
  0x3f   :  { %611 = vperm.xlu1 %2510, %v595_v39   ;;  %605 = vperm.xlu0 %2509, %v593_v40  }
  0x40   :  { %2343 = vmatmul.mubr.msk.bf16.vlgmr.msra.gmra.mxu0 %vm351_vm1, %v394_v13  ;;  %v100_v19 = vmul.f32 %v2103_v14, %v93_v15  ;;  %v101_v20 = vmul.f32 %v2103_v14, %v94_v16  ;;  %v102_v21 = vmul.f32 %v2103_v14, %v95_v17  ;;  %vm808_vm1 = vcmask 359424  }
  0x41   :  { %2356 = vmatprep.mubr.msk.bf16.mxu0 %vm2712_vm2, %v2711_v0 }
  0x42   :  { %v107_v22 = vadd.f32 %v2104_v18, %v100_v19  ;;  %v108_v23 = vadd.f32 %v2104_v18, %v101_v20  ;;  %v109_v24 = vadd.f32 %v2104_v18, %v102_v21 }
  0x43   :  { %617 = vperm.xlu1 %2510, %v597_v45   ;;  %614 = vperm.xlu0 %2509, %v596_v46   ;;  %v2126_v46 = vld [vmem:[%s3263_s4 + $0x9] ss:$0 sm:$0xff] }
  0x44   :  { %v110_v25 = vpack.c.bf16 %v108_v23, %v107_v22  ;;  %v111_v26 = vpack.c.bf16 %v109_v24, %v109_v24 }
  0x46   :  { %2328 = vmatprep.mubr.msk.bf16.mxu1 %vm59_vm5, %v110_v25 }
  0x47   :  { %2329 = vmatmul.mubr.msk.bf16.vlgmr.msra.gmra.mxu1 %vm59_vm5, %v111_v26 }
  0x48   :  { %2333 = vmatpush3.bf16.msra.mxu1 %v2532_v27 }
  0x49   :  { %2334 = vmatprep.subr.bf16.mxu1 %v2533_v28 }
  0x4c   :  { %2335 = vmatpush3.bf16.msra.mxu1 %v2533_v28 }
  0x4d   :  { %2346 = vmatprep.subr.bf16.mxu1 %v2711_v0 }
 0x100   :  { %v448_v30 = vpop.f32.mrf.mxu0 }
 0x101   :  { %v449_v31 = vadd.f32 %v2123_v29, %v448_v30 }
 0x102   :  { %v2344_v32 = vpop.f32.mrf.mxu0 }
 0x103   :  { %v457_v37 = vsel %vm178_vm6, %v449_v31, 0.0 }
 0x104   :  { %v451_v36 = vpop.f32.mrf.mxu0 }
 0x105   :  { %v452_v38 = vadd.f32 %v2123_v29, %v451_v36 }
 0x106   :  { %v2345_v41 = vpop.f32.mrf.mxu0 }
 0x107   :  { %v459_v42 = vsel %vm458_vm7, %v452_v38, 0.0  ;;  %v2330_v44 = vpop.f32.mrf.mxu1 }
 0x108   :  { %v460_v43 = vadd.f32 %v459_v42, %v457_v37  ;;  %v171_v55 = vadd.f32 %v2330_v44, %v2105_v50 }
 0x109   :  { %v162_v48 = vpop.f32.mrf.mxu1 }
 0x10a   :  { %v461_v47 = vrot.slane %v460_v43, 4  ;;  %v163_v52 = vadd.f32 %v2105_v50, %v162_v48  ;;  %v182_v62 = vsel %vm178_vm6, %v171_v55, 0.0 }
 0x10b   :  { %v2331_v51 = vpop.f32.mrf.mxu1 }
 0x10c   :  { %v462_v49 = vadd.f32 %v461_v47, %v460_v43  ;;  %v179_v58 = vsel %vm178_vm6, %v163_v52, 0.0  ;;  %v2127_v51 = vld [vmem:[%s3263_s4 + $0xa] ss:$0 sm:$0xff] }
 0x10d   :  { %v165_v54 = vpop.f32.mrf.mxu1 }
 0x10e   :  { %v463_v53 = vrot.slane %v462_v49, 2  ;;  %v166_v56 = vadd.f32 %v2105_v50, %v165_v54  ;;  %v2108_v50 = vld [vmem:[%s3263_s4 + $0x3] ss:$0 sm:$0xff] }
 0x110   :  { %v464_v57 = vadd.f32 %v463_v53, %v462_v49  ;;  %v180_v59 = vsel %vm178_vm6, %v166_v56, 0.0 }
 0x111   :  { %v181_v61 = vadd.f32 %v180_v59, %v179_v58 }
 0x112   :  { %v465_v60 = vrot.slane %v464_v57, 1 }
 0x113   :  { %v183_v1 = vadd.f32 %v182_v62, %v181_v61 }
 0x114   :  { %v466_v63 = vadd.f32 %v465_v60, %v464_v57 }
 0x115   :  { %v184_v3 = vrot.slane %v183_v1, 4 }
 0x116   :  { %v467_v2 = vmul.f32 0.083333336, %v466_v63 }
 0x117   :  { %v185_v6 = vadd.f32 %v184_v3, %v183_v1 }
 0x118   :  { %v468_v4 = vsub.f32 %v449_v31, %v467_v2  ;;  %v469_v5 = vsub.f32 %v452_v38, %v467_v2 }
 0x119   :  { %v186_v9 = vrot.slane %v185_v6, 2 }
 0x11a   :  { %v470_v7 = vmul.f32 %v468_v4, %v468_v4  ;;  %v471_v8 = vmul.f32 %v469_v5, %v469_v5 }
 0x11b   :  { %v187_v12 = vadd.f32 %v186_v9, %v185_v6 }
 0x11c   :  { %v472_v10 = vsel %vm178_vm6, %v470_v7, 0.0  ;;  %v473_v11 = vsel %vm458_vm7, %v471_v8, 0.0  ;;  %vm982_vm7 = vcmask 195584  }
 0x11d   :  { %v474_v13 = vadd.f32 %v473_v11, %v472_v10  ;;  %v188_v14 = vrot.slane %v187_v12, 1 }
 0x11f   :  { %v475_v15 = vrot.slane %v474_v13, 4  ;;  %v189_v16 = vadd.f32 %v188_v14, %v187_v12 }
 0x121   :  { %v476_v17 = vadd.f32 %v475_v15, %v474_v13  ;;  %v190_v18 = vmul.f32 0.041666668, %v189_v16 }
 0x123   :  { %v477_v19 = vrot.slane %v476_v17, 2  ;;  %v191_v20 = vsub.f32 %v163_v52, %v190_v18  ;;  %v192_v21 = vsub.f32 %v166_v56, %v190_v18  ;;  %v193_v22 = vsub.f32 %v171_v55, %v190_v18  ;;  %v2109_v56 = vld [vmem:[%s3263_s4 + $0x4] ss:$0 sm:$0xff] }
 0x125   :  { %v478_v23 = vadd.f32 %v477_v19, %v476_v17  ;;  %v194_v24 = vmul.f32 %v191_v20, %v191_v20  ;;  %v195_v25 = vmul.f32 %v192_v21, %v192_v21  ;;  %v196_v26 = vmul.f32 %v193_v22, %v193_v22 }
 0x127   :  { %v479_v27 = vrot.slane %v478_v23, 1  ;;  %v197_v28 = vsel %vm178_vm6, %v194_v24, 0.0  ;;  %v198_v29 = vsel %vm178_vm6, %v195_v25, 0.0  ;;  %v200_v32 = vsel %vm178_vm6, %v196_v26, 0.0  ;;  %v2534_v25 = vld [vmem:[%s3265_s8 + $0x8] sm:$0xff]  }
 0x128   :  { %v199_v30 = vadd.f32 %v198_v29, %v197_v28  ;;  %v2535_v28 = vld [vmem:[%s3265_s8] sm:$0xff]  }
 0x129   :  { %v480_v31 = vadd.f32 %v479_v27, %v478_v23 }
 0x12a   :  { %v201_v33 = vadd.f32 %v200_v32, %v199_v30 }
 0x12b   :  { %v481_v35 = vmul.f32 0.083333336, %v480_v31 }
 0x12c   :  { %v202_v34 = vrot.slane %v201_v33, 4 }
 0x12d   :  { %v482_v38 = vadd.f32 1e-05, %v481_v35 }
 0x12e   :  { %v203_v36 = vadd.f32 %v202_v34, %v201_v33 }
 0x12f   :  { %2567 = vrsqrt.f32 %v482_v38 }
 0x130   :  { %v204_v37 = vrot.slane %v203_v36, 2 }
 0x132   :  { %v205_v39 = vadd.f32 %v204_v37, %v203_v36  ;;  %v2130_v36 = vld [vmem:[%s3263_s4 + $0xb] ss:$0 sm:$0xff] }
 0x134   :  { %v206_v40 = vrot.slane %v205_v39, 1 }
 0x136   :  { %v207_v41 = vadd.f32 %v206_v40, %v205_v39 }
 0x138   :  { %v208_v42 = vmul.f32 0.041666668, %v207_v41 }
 0x13a   :  { %v209_v43 = vadd.f32 1e-05, %v208_v42 }
 0x13c   :  { %2569 = vrsqrt.f32 %v209_v43  ;;  %v2568_v44 = vpop.eup %2567 }
 0x13d   :  { %v484_v45 = vmul.f32 %v2568_v44, %v468_v4  ;;  %v485_v47 = vmul.f32 %v2568_v44, %v469_v5 }
 0x13f   :  { %v490_v49 = vmul.f32 %v2126_v46, %v484_v45  ;;  %v491_v55 = vmul.f32 %v2126_v46, %v485_v47 }
 0x141   :  { %v496_v60 = vadd.f32 %v2127_v51, %v490_v49  ;;  %v497_v1 = vadd.f32 %v2127_v51, %v491_v55  ;;  %v599_v49 = vlaneseq }
 0x143   :  { %v2128_v4 = vmul.f32 -1.442695, %v496_v60  ;;  %v2129_v6 = vmul.f32 -1.442695, %v497_v1  ;;  %v2929_v51 = vand.u32 127, %v599_v49 }
 0x149   :  { %v2570_v48 = vpop.eup %2569 }
 0x14a   :  { %v211_v52 = vmul.f32 %v2570_v48, %v191_v20  ;;  %v212_v53 = vmul.f32 %v2570_v48, %v192_v21  ;;  %v213_v54 = vmul.f32 %v2570_v48, %v193_v22 }
 0x14c   :  { %v218_v57 = vmul.f32 %v2108_v50, %v211_v52  ;;  %v219_v58 = vmul.f32 %v2108_v50, %v212_v53  ;;  %v220_v59 = vmul.f32 %v2108_v50, %v213_v54  ;;  %v603_v50 = vpop.permute.xlu0 %602 }
 0x14d   :  { %vm619_vm8 = vcmp.eq.s32.totalorder %v603_v50, %v2929_v51 }
 0x14e   :  { %v226_v61 = vadd.f32 %v2109_v56, %v219_v58  ;;  %v227_v62 = vadd.f32 %v2109_v56, %v220_v59  ;;  %v225_v63 = vadd.f32 %v2109_v56, %v218_v57  ;;  %v609_v57 = vpop.permute.xlu1 %608  ;;  %v2136_v59 = vsel %vm619_vm8, 1.0, %v2711_v0 }
 0x14f   :  { %vm621_vm12 = vcmp.eq.s32.totalorder %v609_v57, %v2929_v51  ;;  %vm1039_vm8 = vcmask 64512  }
 0x150   :  { %v2111_v2 = vmul.f32 -1.442695, %v226_v61  ;;  %v2112_v3 = vmul.f32 -1.442695, %v227_v62  ;;  %v2110_v5 = vmul.f32 -1.442695, %v225_v63  ;;  %v606_v54 = vpop.permute.xlu0 %605 }
 0x151   :  { %vm620_vm9 = vcmp.eq.s32.totalorder %v606_v54, %v2929_v51 }
 0x152   :  { %2571 = vpow2.f32 %v2111_v2 }
 0x153   :  { %2573 = vpow2.f32 %v2112_v3 }
 0x154   :  { %2575 = vpow2.f32 %v2128_v4  ;;  %v615_v4 = vpop.permute.xlu0 %614 }
 0x155   :  { %2577 = vpow2.f32 %v2110_v5  ;;  %vm623_vm15 = vcmp.eq.s32.totalorder %v615_v4, %v2929_v51  ;;  %v2539_v4 = vld [vmem:[%s3268_s10 + $0x8] sm:$0xff]  }
 0x156   :  { %2579 = vpow2.f32 %v2129_v6 }
 0x15f   :  { %v2572_v7 = vpop.eup %2571 }
 0x160   :  { %v2574_v8 = vpop.eup %2573  ;;  %v238_v9 = vadd.f32 1.0, %v2572_v7  ;;  %v2140_v7 = vsel %vm623_vm15, 1.0, %v2711_v0 }
 0x161   :  { %v239_v10 = vadd.f32 1.0, %v2574_v8  ;;  %v2576_v11 = vpop.eup %2575 }
 0x162   :  { %2581 = vrcp.f32 %v238_v9  ;;  %v2578_v12 = vpop.eup %2577  ;;  %v504_v15 = vadd.f32 1.0, %v2576_v11  ;;  %v2536_v9 = vld [vmem:[%s3267_s9 + $0x10] sm:$0x3f]  }
 0x163   :  { %2583 = vrcp.f32 %v239_v10  ;;  %v2580_v13 = vpop.eup %2579  ;;  %v237_v14 = vadd.f32 1.0, %v2578_v12  ;;  %v2537_v10 = vld [vmem:[%s3267_s9 + $0x8] sm:$0xff]   ;;  %v816_v11 = vsel %vm693_vm10, %v2536_v9, 0 }
 0x164   :  { %v505_v16 = vadd.f32 1.0, %v2580_v13 }
 0x165   :  { %2585 = vrcp.f32 %v237_v14 }
 0x166   :  { %2587 = vrcp.f32 %v504_v15 }
 0x167   :  { %2589 = vrcp.f32 %v505_v16 }
 0x16f   :  { %v2582_v17 = vpop.eup %2581 }
 0x170   :  { %v2584_v18 = vpop.eup %2583  ;;  %v247_v20 = vmul.f32 %v2582_v17, %v226_v61  ;;  %v2538_v17 = vld [vmem:[%s3267_s9] sm:$0xff]  }
 0x171   :  { %v248_v19 = vmul.f32 %v2584_v18, %v227_v62 }
 0x172   :  { %v2586_v21 = vpop.eup %2585 }
 0x173   :  { %v246_v22 = vmul.f32 %v2586_v21, %v225_v63  ;;  %v250_v23 = vpack.c.bf16 %v248_v19, %v248_v19  ;;  %v2588_v26 = vpop.eup %2587  ;;  %v612_v63 = vpop.permute.xlu1 %611 }
 0x174   :  { %v2590_v27 = vpop.eup %2589  ;;  %v510_v29 = vmul.f32 %v2588_v26, %v496_v60  ;;  %v2137_v60 = vsel %vm620_vm9, 1.0, %v2711_v0  ;;  %vm622_vm13 = vcmp.eq.s32.totalorder %v612_v63, %v2929_v51  ;;  %vm1043_vm9 = vcmask 191488  }
 0x175   :  { %v249_v24 = vpack.c.bf16 %v247_v20, %v246_v22  ;;  %v511_v30 = vmul.f32 %v2590_v27, %v497_v1  ;;  %v2942_v62 = vpack.c.bf16 %v2137_v60, %v2136_v59  ;;  %v2138_v1 = vsel %vm621_vm12, 1.0, %v2711_v0  ;;  %v2113_v27 = vld [vmem:[%s3263_s4 + $0x5] ss:$0 sm:$0xff] }
 0x176   :  { %v2139_v2 = vsel %vm622_vm13, 1.0, %v2711_v0 }
 0x177   :  { %2336 = vmatprep.mubr.msk.bf16.mxu1 %vm178_vm6, %v249_v24  ;;  %v512_v31 = vpack.c.bf16 %v511_v30, %v510_v29  ;;  %v618_v3 = vpop.permute.xlu1 %617  ;;  %v2953_v5 = vpack.c.bf16 %v2139_v2, %v2138_v1 }
 0x178   :  { %2337 = vmatmul.mubr.msk.bf16.vlgmr.msra.gmra.mxu1 %vm178_vm6, %v250_v23  ;;  %vm624_vm14 = vcmp.eq.s32.totalorder %v618_v3, %v2929_v51 }
 0x179   :  { %2347 = vmatpush3.bf16.msra.mxu1 %v2534_v25  ;;  %2350 = vmatprep.mubr.msk.bf16.mxu1 %vm2712_vm2, %v2711_v0  ;;  %v2141_v6 = vsel %vm624_vm14, 1.0, %v2711_v0 }
 0x17a   :  { %2348 = vmatprep.subr.bf16.mxu1 %v2711_v0  ;;  %v2963_v8 = vpack.c.bf16 %v2141_v6, %v2140_v7  ;;  %v2540_v6 = vld [vmem:[%s3268_s10] sm:$0xff]   ;;  %v2148_v7 = vld [vmem:[%s3263_s4 + $0xc] ss:$0 sm:$0xff] }
 0x17d   :  { %2349 = vmatpush3.bf16.msra.mxu1 %v2535_v28 }
 0x17e   :  { %2501 = vmatprep.subr.msk.bf16.mxu1 %vm693_vm10, %v2536_v9 }
 0x180   :  { %2351 = vmatmul.mubr.msk.bf16.vlgmr.msra.gmra.mxu1 %vm178_vm6, %v512_v31 }
 0x181   :  { %2369 = vmatpush3.bf16.msra.mxu1 %v816_v11 }
 0x182   :  { %2370 = vmatprep.subr.bf16.mxu1 %v2537_v10 }
 0x185   :  { %2371 = vmatpush3.bf16.msra.mxu1 %v2537_v10 }
 0x186   :  { %2372 = vmatprep.subr.bf16.mxu1 %v2538_v17 }
 0x189   :  { %2373 = vmatpush3.bf16.msra.mxu1 %v2538_v17 }
 0x18a   :  { %2378 = vmatprep.subr.bf16.mxu1 %v2539_v4 }
 0x238   :  { %v2919_v32 = vpop.f32.mrf.mxu1 }
 0x239   :  { %v321_v28 = vadd.f32 %v2919_v32, %v2113_v27 }
 0x23a   :  { %v2921_v33 = vpop.f32.mrf.mxu1 }
 0x23b   :  { %v313_v29 = vadd.f32 %v2113_v27, %v2921_v33  ;;  %v2120_v31 = vmul.f32 -1.442695, %v321_v28 }
 0x23c   :  { %v2339_v34 = vpop.f32.mrf.mxu1 }
 0x23d   :  { %v2118_v34 = vmul.f32 -1.442695, %v313_v29 }
 0x23e   :  { %v2923_v35 = vpop.f32.mrf.mxu1 }
 0x23f   :  { %v316_v30 = vadd.f32 %v2113_v27, %v2923_v35 }
 0x240   :  { %v571_v37 = vpop.f32.mrf.mxu1 }
 0x241   :  { %v572_v38 = vadd.f32 %v2130_v36, %v571_v37 }
 0x242   :  { %v2352_v39 = vpop.f32.mrf.mxu1 }
 0x243   :  { %v2134_v40 = vmul.f32 -1.442695, %v572_v38 }
 0x244   :  { %v574_v41 = vpop.f32.mrf.mxu1 }
 0x245   :  { %2591 = vpow2.f32 %v2134_v40  ;;  %v575_v42 = vadd.f32 %v2130_v36, %v574_v41  ;;  %v2119_v36 = vmul.f32 -1.442695, %v316_v30 }
 0x246   :  { %v2353_v43 = vpop.f32.mrf.mxu1 }
 0x247   :  { %v2135_v44 = vmul.f32 -1.442695, %v575_v42 }
 0x249   :  { %2593 = vpow2.f32 %v2135_v44 }
 0x252   :  { %v2592_v45 = vpop.eup %2591 }
 0x253   :  { %v584_v46 = vadd.f32 1.0, %v2592_v45 }
 0x255   :  { %2595 = vrcp.f32 %v584_v46 }
 0x256   :  { %v2594_v47 = vpop.eup %2593 }
 0x257   :  { %v585_v48 = vadd.f32 1.0, %v2594_v47 }
 0x259   :  { %2597 = vrcp.f32 %v585_v48 }
 0x25a   :  { %2599 = vpow2.f32 %v2120_v31 }
 0x25b   :  { %2601 = vpow2.f32 %v2118_v34 }
 0x25c   :  { %2603 = vpow2.f32 %v2119_v36  ;;  %v2157_v36 = vld [vmem:[%s3263_s4 + $0xd] ss:$0 sm:$0xff] }
 0x262   :  { %v2596_v52 = vpop.eup %2595 }
 0x263   :  { %v2931_v55 = vmul.f32 %v2596_v52, %v572_v38 }
 0x266   :  { %v2598_v53 = vpop.eup %2597 }
 0x267   :  { %v2933_v56 = vmul.f32 %v2598_v53, %v575_v42  ;;  %v2600_v37 = vpop.eup %2599 }
 0x268   :  { %v2602_v38 = vpop.eup %2601  ;;  %v337_v40 = vadd.f32 1.0, %v2600_v37 }
 0x269   :  { %v682_v58 = vpack.c.bf16 %v2933_v56, %v2931_v55  ;;  %v2604_v39 = vpop.eup %2603  ;;  %v335_v41 = vadd.f32 1.0, %v2602_v38 }
 0x26a   :  { %v336_v42 = vadd.f32 1.0, %v2604_v39  ;;  %2605 = vrcp.f32 %v337_v40 }
 0x26b   :  { %v695_v61 = vsel %vm693_vm10, %v682_v58, 0  ;;  %2607 = vrcp.f32 %v335_v41 }
 0x26c   :  { %2355 = vmatpush3.bf16.msra.mxu0 %v695_v61  ;;  %2609 = vrcp.f32 %v336_v42 }
 0x26d   :  { %2386 = vmatprep.subr.bf16.mxu0 %v2711_v0 }
 0x26f   :  { %2357 = vmatmul.mubr.msk.bf16.vlgmr.msra.gmra.mxu0 %vm683_vm11, %v2942_v62 }
 0x270   :  { %2360 = vmatprep.mubr.msk.bf16.mxu0 %vm2712_vm2, %v2711_v0 }
 0x277   :  { %2361 = vmatmul.mubr.msk.bf16.gmra.mxu0 %vm683_vm11, %v2953_v5  ;;  %v2606_v32 = vpop.eup %2605 }
 0x278   :  { %2364 = vmatprep.mubr.msk.bf16.mxu0 %vm2712_vm2, %v2711_v0  ;;  %v2608_v33 = vpop.eup %2607  ;;  %v2994_v47 = vmul.f32 %v2606_v32, %v321_v28 }
 0x279   :  { %v2610_v44 = vpop.eup %2609  ;;  %v2996_v48 = vmul.f32 %v2608_v33, %v313_v29 }
 0x27a   :  { %v2998_v50 = vmul.f32 %v2610_v44, %v316_v30 }
 0x27f   :  { %2365 = vmatmul.mubr.msk.bf16.gmra.mxu0 %vm683_vm11, %v2963_v8 }
 0x280   :  { %2390 = vmatprep.mubr.msk.bf16.mxu0 %vm2712_vm2, %v2711_v0 }
 0x32f   :  { %v731_v12 = vpop.f32.mrf.mxu0 }
 0x331   :  { %v2358_v13 = vpop.f32.mrf.mxu0 }
 0x333   :  { %v734_v14 = vpop.f32.mrf.mxu0 }
 0x334   :  { %v2511_v15 = vpack.i.bf16 %v734_v14, %v731_v12 }
 0x335   :  { %v2359_v16 = vpop.f32.mrf.mxu0 }
 0x336   :  { %2512 = vrot.lane.b32.xlu0 %v2511_v15, %s2714_s26 }
 0x337   :  { %v739_v18 = vpop.f32.mrf.mxu0 }
 0x338   :  { %761 = vrot.lane.b32.xlu1 %v739_v18, %s2714_s26 }
 0x339   :  { %v2362_v19 = vpop.f32.mrf.mxu0 }
 0x33b   :  { %v742_v20 = vpop.f32.mrf.mxu0 }
 0x33d   :  { %v2363_v21 = vpop.f32.mrf.mxu0 }
 0x33f   :  { %v747_v22 = vpop.f32.mrf.mxu0 }
 0x340   :  { %v2516_v23 = vpack.i.bf16 %v747_v22, %v742_v20 }
 0x341   :  { %v2366_v24 = vpop.f32.mrf.mxu0 }
 0x342   :  { %2517 = vrot.lane.b32.xlu0 %v2516_v23, %s2715_s0 }
 0x343   :  { %v750_v25 = vpop.f32.mrf.mxu0 }
 0x344   :  { %773 = vrot.lane.b32.xlu1 %v750_v25, %s2715_s0 }
 0x345   :  { %v2367_v26 = vpop.f32.mrf.mxu0 }
 0x346   :  { %1033 = vrot.lane.b32.xlu0 %v2931_v55, %s2716_s27 }
 0x348   :  { %1035 = vrot.lane.b32.xlu1 %v2933_v56, %s2716_s27 }
 0x3a8   :  { %v2513_v43 = vpop.permute.xlu0 %2512 }
 0x3a9   :  { %v2515_v35 = vunpack.i.h.bf16 %v2513_v43  ;;  %v2514_v45 = vunpack.i.l.bf16 %v2513_v43 }
 0x3aa   :  { %v762_v46 = vpop.permute.xlu1 %761 }
 0x3ab   :  { %v779_v57 = vsel %vm683_vm11, %v2998_v50, %v2515_v35  ;;  %v778_v58 = vsel %vm683_vm11, %v2996_v48, %v2514_v45  ;;  %v780_v59 = vsel %vm683_vm11, %v2994_v47, %v762_v46 }
 0x3b4   :  { %v2518_v52 = vpop.permute.xlu0 %2517 }
 0x3b5   :  { %v2520_v53 = vunpack.i.h.bf16 %v2518_v52  ;;  %v2519_v54 = vunpack.i.l.bf16 %v2518_v52 }
 0x3b6   :  { %v774_v60 = vpop.permute.xlu1 %773 }
 0x3b7   :  { %v782_v61 = vsel %vm781_vm0, %v778_v58, %v2519_v54  ;;  %v783_v63 = vsel %vm781_vm0, %v779_v57, %v2520_v53  ;;  %v784_v1 = vsel %vm781_vm0, %v780_v59, %v774_v60  ;;  %v641_v57 = vshrl.u32 %v599_v49, 7 }
 0x3b8   :  { %v785_v2 = vpack.c.bf16 %v783_v63, %v782_v61  ;;  %v786_v3 = vpack.c.bf16 %v784_v1, %v784_v1  ;;  %v2142_v61 = vld [vmem:[%s3269_s1] ss:$0 sm:$0xff] }
 0x3b9   :  { %v642_v59 = vadd.s32 8, %v641_v57  ;;  %vm647_vm4 = vcmp.eq.s32.totalorder %v2142_v61, %v641_v57 }
 0x3ba   :  { %2374 = vmatprep.mubr.msk.bf16.mxu1 %vm808_vm1, %v785_v2  ;;  %v2143_v49 = vsel %vm647_vm4, 1.0, %v2711_v0 }
 0x3bb   :  { %2375 = vmatmul.mubr.msk.bf16.vlgmr.msra.gmra.mxu1 %vm808_vm1, %v786_v3  ;;  %vm648_vm5 = vcmp.eq.s32.totalorder %v2142_v61, %v642_v59 }
 0x3bc   :  { %2379 = vmatpush3.bf16.msra.mxu1 %v2539_v4 }
 0x3bd   :  { %2380 = vmatprep.subr.bf16.mxu1 %v2540_v6 }
 0x3c0   :  { %2381 = vmatpush3.bf16.msra.mxu1 %v2540_v6 }
 0x3c1   :  { %2394 = vmatprep.subr.bf16.mxu1 %v2711_v0 }
 0x47b   :  { %v2376_v9 = vpop.f32.mrf.mxu1 }
 0x47c   :  { %v861_v10 = vadd.f32 %v2376_v9, %v2148_v7 }
 0x47d   :  { %v852_v11 = vpop.f32.mrf.mxu1 }
 0x47e   :  { %v2156_v12 = vmul.f32 -1.442695, %v861_v10  ;;  %v853_v13 = vadd.f32 %v2148_v7, %v852_v11  ;;  %v2541_v11 = vld [vmem:[%s3270_s11 + $0x8] ss:$0 sps:$4 sm:$0xff]  }
 0x47f   :  { %v2377_v14 = vpop.f32.mrf.mxu1 }
 0x480   :  { %2611 = vpow2.f32 %v2156_v12  ;;  %v2154_v15 = vmul.f32 -1.442695, %v853_v13  ;;  %v1101_v12 = vsel %vm986_vm3, %v2541_v11, 0 }
 0x481   :  { %v855_v16 = vpop.f32.mrf.mxu1 }
 0x482   :  { %2613 = vpow2.f32 %v2154_v15  ;;  %v856_v17 = vadd.f32 %v2148_v7, %v855_v16  ;;  %v2144_v7 = vsel %vm648_vm5, 1.0, %v2711_v0  ;;  %v1034_v15 = vpop.permute.xlu0 %1033 }
 0x484   :  { %v2155_v18 = vmul.f32 -1.442695, %v856_v17 }
 0x486   :  { %2615 = vpow2.f32 %v2155_v18  ;;  %v1036_v18 = vpop.permute.xlu1 %1035 }
 0x48d   :  { %v2612_v19 = vpop.eup %2611 }
 0x48e   :  { %v877_v21 = vadd.f32 1.0, %v2612_v19 }
 0x48f   :  { %v2614_v20 = vpop.eup %2613 }
 0x490   :  { %v875_v22 = vadd.f32 1.0, %v2614_v20  ;;  %2617 = vrcp.f32 %v877_v21 }
 0x492   :  { %2619 = vrcp.f32 %v875_v22 }
 0x493   :  { %v2616_v23 = vpop.eup %2615 }
 0x494   :  { %v876_v24 = vadd.f32 1.0, %v2616_v23 }
 0x496   :  { %2621 = vrcp.f32 %v876_v24 }
 0x49d   :  { %v2618_v25 = vpop.eup %2617 }
 0x49e   :  { %v886_v28 = vmul.f32 %v2618_v25, %v861_v10  ;;  %v3036_v10 = vpack.c.bf16 %v2144_v7, %v2143_v49 }
 0x49f   :  { %v2620_v26 = vpop.eup %2619 }
 0x4a0   :  { %v884_v29 = vmul.f32 %v2620_v26, %v853_v13  ;;  %v888_v34 = vpack.c.bf16 %v886_v28, %v886_v28  ;;  %v2542_v13 = vld [vmem:[%s3270_s11] sm:$0xff]  }
 0x4a3   :  { %v2622_v27 = vpop.eup %2621 }
 0x4a4   :  { %v885_v30 = vmul.f32 %v2622_v27, %v856_v17 }
 0x4a6   :  { %v887_v31 = vpack.c.bf16 %v885_v30, %v884_v29 }
 0x4a8   :  { %2382 = vmatprep.mubr.msk.bf16.mxu1 %vm178_vm6, %v887_v31 }
 0x4a9   :  { %2383 = vmatmul.mubr.msk.bf16.vlgmr.msra.gmra.mxu1 %vm178_vm6, %v888_v34 }
 0x4aa   :  { %2398 = vmatprep.mubr.msk.bf16.mxu1 %vm2712_vm2, %v2711_v0  ;;  %2395 = vmatpush3.bf16.msra.mxu1 %v1101_v12 }
 0x4ab   :  { %2396 = vmatprep.subr.bf16.mxu1 %v2711_v0 }
 0x4ae   :  { %2397 = vmatpush3.bf16.msra.mxu1 %v2542_v13 }
 0x4af   :  { %2410 = vmatprep.subr.bf16.mxu1 %v2711_v0 }
 0x569   :  { %v2384_v37 = vpop.f32.mrf.mxu1 }
 0x56a   :  { %v954_v38 = vadd.f32 %v2384_v37, %v2157_v36 }
 0x56b   :  { %v945_v39 = vpop.f32.mrf.mxu1 }
 0x56c   :  { %v2164_v40 = vmul.f32 -1.442695, %v954_v38  ;;  %v946_v41 = vadd.f32 %v2157_v36, %v945_v39 }
 0x56d   :  { %v2385_v42 = vpop.f32.mrf.mxu1 }
 0x56e   :  { %2623 = vpow2.f32 %v2164_v40  ;;  %v2162_v32 = vmul.f32 -1.442695, %v946_v41 }
 0x56f   :  { %v948_v43 = vpop.f32.mrf.mxu1 }
 0x570   :  { %2625 = vpow2.f32 %v2162_v32  ;;  %v949_v33 = vadd.f32 %v2157_v36, %v948_v43 }
 0x572   :  { %v2163_v44 = vmul.f32 -1.442695, %v949_v33 }
 0x574   :  { %2627 = vpow2.f32 %v2163_v44 }
 0x57b   :  { %v2624_v35 = vpop.eup %2623 }
 0x57c   :  { %v970_v45 = vadd.f32 1.0, %v2624_v35 }
 0x57d   :  { %v2626_v46 = vpop.eup %2625 }
 0x57e   :  { %2629 = vrcp.f32 %v970_v45  ;;  %v968_v52 = vadd.f32 1.0, %v2626_v46 }
 0x580   :  { %2631 = vrcp.f32 %v968_v52 }
 0x581   :  { %v2628_v53 = vpop.eup %2627 }
 0x582   :  { %v969_v54 = vadd.f32 1.0, %v2628_v53  ;;  %v2166_v53 = vld [vmem:[%s3263_s4 + $0xe] ss:$0 sm:$0xff] }
 0x584   :  { %2633 = vrcp.f32 %v969_v54 }
 0x58b   :  { %v2630_v58 = vpop.eup %2629 }
 0x58c   :  { %v979_v60 = vmul.f32 %v2630_v58, %v954_v38  ;;  %v2167_v58 = vld [vmem:[%s3263_s4 + $0xf] ss:$0 sm:$0xff] }
 0x58d   :  { %v2632_v1 = vpop.eup %2631 }
 0x58e   :  { %v981_v63 = vpack.c.bf16 %v979_v60, %v979_v60  ;;  %v977_v4 = vmul.f32 %v2632_v1, %v946_v41 }
 0x590   :  { %v988_v2 = vsel %vm986_vm3, %v981_v63, 0 }
 0x591   :  { %v2634_v3 = vpop.eup %2633  ;;  %2387 = vmatpush3.bf16.msra.mxu0 %v988_v2  ;;  %v2543_v2 = vld [vmem:[%s3271_s12 + $0x8] sm:$0xff]  }
 0x592   :  { %v978_v6 = vmul.f32 %v2634_v3, %v949_v33  ;;  %2388 = vmatprep.subr.bf16.mxu0 %v2711_v0  ;;  %v2544_v3 = vld [vmem:[%s3271_s12] sm:$0xff]  }
 0x594   :  { %v980_v9 = vpack.c.bf16 %v978_v6, %v977_v4  ;;  %v2168_v4 = vld [vmem:[%s3263_s4 + $0x10] ss:$0 sm:$0xff] }
 0x596   :  { %2389 = vmatpush3.bf16.msra.mxu0 %v980_v9 }
 0x597   :  { %2402 = vmatprep.subr.bf16.mxu0 %v2711_v0 }
 0x599   :  { %2391 = vmatmul.mubr.msk.bf16.vlgmr.msra.gmra.mxu0 %vm982_vm7, %v3036_v10 }
 0x59a   :  { %2406 = vmatprep.mubr.msk.bf16.mxu0 %vm2712_vm2, %v2711_v0  ;;  %2403 = vmatpush3.bf16.msra.mxu0 %v2543_v2 }
 0x59b   :  { %2404 = vmatprep.subr.bf16.mxu0 %v2711_v0 }
 0x59e   :  { %2405 = vmatpush3.bf16.msra.mxu0 %v2544_v3  ;;  %v2549_v3 = vld [vmem:[%s3267_s9 + $0x18] sm:$0xff]  }
 0x59f   :  { %2418 = vmatprep.subr.bf16.mxu0 %v2711_v0 }
 0x659   :  { %v1024_v14 = vpop.f32.mrf.mxu0 }
 0x65a   :  { %v1040_v17 = vsel %vm1039_vm8, %v1024_v14, %v1034_v15 }
 0x65b   :  { %v2392_v16 = vpop.f32.mrf.mxu0  ;;  %v1042_v21 = vsel %vm982_vm7, %v1040_v17, 0.0 }
 0x65d   :  { %v1027_v19 = vpop.f32.mrf.mxu0 }
 0x65e   :  { %v1041_v20 = vsel %vm1039_vm8, %v1027_v19, %v1036_v18 }
 0x65f   :  { %v1044_v22 = vsel %vm1043_vm9, %v1041_v20, 0.0  ;;  %v2393_v23 = vpop.f32.mrf.mxu0 }
 0x660   :  { %v1045_v24 = vadd.f32 %v1044_v22, %v1042_v21 }
 0x662   :  { %v1046_v25 = vrot.slane %v1045_v24, 4 }
 0x664   :  { %v1047_v26 = vadd.f32 %v1046_v25, %v1045_v24  ;;  %v2545_v24 = vld [vmem:[%s3272_s13 + $0x8] sm:$0xff]   ;;  %v2546_v25 = vld [vmem:[%s3272_s13] sm:$0xff]  }
 0x666   :  { %v1048_v27 = vrot.slane %v1047_v26, 2 }
 0x668   :  { %v1049_v28 = vadd.f32 %v1048_v27, %v1047_v26  ;;  %v2174_v26 = vld [vmem:[%s3263_s4 + $0x11] ss:$0 sm:$0xff] }
 0x66a   :  { %v1050_v29 = vrot.slane %v1049_v28, 1 }
 0x66c   :  { %v1051_v30 = vadd.f32 %v1050_v29, %v1049_v28 }
 0x66e   :  { %v1052_v31 = vmul.f32 0.083333336, %v1051_v30 }
 0x670   :  { %v1053_v34 = vsub.f32 %v1040_v17, %v1052_v31  ;;  %v1054_v36 = vsub.f32 %v1041_v20, %v1052_v31 }
 0x672   :  { %v1055_v37 = vmul.f32 %v1053_v34, %v1053_v34  ;;  %v1056_v38 = vmul.f32 %v1054_v36, %v1054_v36 }
 0x674   :  { %v1057_v39 = vsel %vm982_vm7, %v1055_v37, 0.0  ;;  %v1058_v40 = vsel %vm1043_vm9, %v1056_v38, 0.0 }
 0x675   :  { %v1059_v41 = vadd.f32 %v1058_v40, %v1057_v39 }
 0x677   :  { %v1060_v42 = vrot.slane %v1059_v41, 4 }
 0x679   :  { %v1061_v32 = vadd.f32 %v1060_v42, %v1059_v41 }
 0x67b   :  { %v1062_v43 = vrot.slane %v1061_v32, 2 }
 0x67d   :  { %v1063_v33 = vadd.f32 %v1062_v43, %v1061_v32 }
 0x67f   :  { %v1064_v44 = vrot.slane %v1063_v33, 1 }
 0x681   :  { %v1065_v35 = vadd.f32 %v1064_v44, %v1063_v33 }
 0x683   :  { %v1066_v45 = vmul.f32 0.083333336, %v1065_v35  ;;  %v2180_v35 = vld [vmem:[%s3263_s4 + $0x12] ss:$0 sm:$0xff] }
 0x685   :  { %v1067_v46 = vadd.f32 1e-05, %v1066_v45 }
 0x687   :  { %2635 = vrsqrt.f32 %v1067_v46 }
 0x694   :  { %v2636_v52 = vpop.eup %2635 }
 0x695   :  { %v1069_v54 = vmul.f32 %v2636_v52, %v1053_v34  ;;  %v1070_v57 = vmul.f32 %v2636_v52, %v1054_v36 }
 0x697   :  { %v1075_v59 = vmul.f32 %v2166_v53, %v1069_v54  ;;  %v1076_v60 = vmul.f32 %v2166_v53, %v1070_v57 }
 0x699   :  { %v1081_v61 = vadd.f32 %v2167_v58, %v1075_v59  ;;  %v1082_v63 = vadd.f32 %v2167_v58, %v1076_v60 }
 0x69b   :  { %v1083_v1 = vpack.c.bf16 %v1082_v63, %v1081_v61 }
 0x69d   :  { %2399 = vmatmul.mubr.msk.bf16.vlgmr.msra.gmra.mxu1 %vm982_vm7, %v1083_v1 }
 0x69e   :  { %2414 = vmatprep.mubr.msk.bf16.mxu1 %vm2712_vm2, %v2711_v0  ;;  %2411 = vmatpush3.bf16.msra.mxu1 %v2545_v24 }
 0x69f   :  { %2412 = vmatprep.subr.bf16.mxu1 %v2711_v0 }
 0x6a2   :  { %2413 = vmatpush3.bf16.msra.mxu1 %v2546_v25 }
 0x75d   :  { %v1137_v6 = vpop.f32.mrf.mxu1 }
 0x75e   :  { %v1138_v49 = vadd.f32 %v2168_v4, %v1137_v6 }
 0x75f   :  { %v2400_v7 = vpop.f32.mrf.mxu1 }
 0x760   :  { %v2172_v9 = vmul.f32 -1.442695, %v1138_v49 }
 0x761   :  { %v1140_v11 = vpop.f32.mrf.mxu1 }
 0x762   :  { %2637 = vpow2.f32 %v2172_v9  ;;  %v1141_v12 = vadd.f32 %v2168_v4, %v1140_v11 }
 0x763   :  { %v2401_v13 = vpop.f32.mrf.mxu1 }
 0x764   :  { %v2173_v14 = vmul.f32 -1.442695, %v1141_v12 }
 0x766   :  { %2639 = vpow2.f32 %v2173_v14 }
 0x76f   :  { %v2638_v15 = vpop.eup %2637 }
 0x770   :  { %v1150_v16 = vadd.f32 1.0, %v2638_v15 }
 0x772   :  { %2641 = vrcp.f32 %v1150_v16 }
 0x773   :  { %v2640_v17 = vpop.eup %2639 }
 0x774   :  { %v1151_v18 = vadd.f32 1.0, %v2640_v17 }
 0x776   :  { %2643 = vrcp.f32 %v1151_v18 }
 0x77f   :  { %v2642_v19 = vpop.eup %2641 }
 0x780   :  { %v1156_v21 = vmul.f32 %v2642_v19, %v1138_v49 }
 0x783   :  { %v2644_v20 = vpop.eup %2643 }
 0x784   :  { %v1157_v22 = vmul.f32 %v2644_v20, %v1141_v12 }
 0x786   :  { %v1158_v23 = vpack.c.bf16 %v1157_v22, %v1156_v21 }
 0x788   :  { %2407 = vmatmul.mubr.msk.bf16.vlgmr.msra.gmra.mxu0 %vm178_vm6, %v1158_v23 }
 0x789   :  { %2420 = vmatprep.mubr.msk.bf16.mxu0 %vm2712_vm2, %v2711_v0 }
 0x848   :  { %v1212_v27 = vpop.f32.mrf.mxu0 }
 0x849   :  { %v1213_v28 = vadd.f32 %v2174_v26, %v1212_v27 }
 0x84a   :  { %v2408_v29 = vpop.f32.mrf.mxu0 }
 0x84b   :  { %v2178_v30 = vmul.f32 -1.442695, %v1213_v28 }
 0x84c   :  { %v1215_v31 = vpop.f32.mrf.mxu0 }
 0x84d   :  { %2645 = vpow2.f32 %v2178_v30  ;;  %v1216_v34 = vadd.f32 %v2174_v26, %v1215_v31 }
 0x84e   :  { %v2409_v36 = vpop.f32.mrf.mxu0 }
 0x84f   :  { %v2179_v37 = vmul.f32 -1.442695, %v1216_v34 }
 0x851   :  { %2647 = vpow2.f32 %v2179_v37 }
 0x85a   :  { %v2646_v38 = vpop.eup %2645 }
 0x85b   :  { %v1225_v39 = vadd.f32 1.0, %v2646_v38 }
 0x85d   :  { %2649 = vrcp.f32 %v1225_v39 }
 0x85e   :  { %v2648_v40 = vpop.eup %2647 }
 0x85f   :  { %v1226_v41 = vadd.f32 1.0, %v2648_v40 }
 0x861   :  { %2651 = vrcp.f32 %v1226_v41 }
 0x86a   :  { %v2650_v42 = vpop.eup %2649 }
 0x86b   :  { %v1231_v43 = vmul.f32 %v2650_v42, %v1213_v28 }
 0x86e   :  { %v2652_v32 = vpop.eup %2651 }
 0x86f   :  { %v1232_v33 = vmul.f32 %v2652_v32, %v1216_v34 }
 0x871   :  { %v1233_v44 = vpack.c.bf16 %v1232_v33, %v1231_v43 }
 0x873   :  { %2415 = vmatmul.mubr.msk.bf16.vlgmr.msra.gmra.mxu1 %vm178_vm6, %v1233_v44 }
 0x933   :  { %v1287_v45 = vpop.f32.mrf.mxu1 }
 0x934   :  { %v1288_v52 = vadd.f32 %v2180_v35, %v1287_v45 }
 0x935   :  { %v2416_v46 = vpop.f32.mrf.mxu1 }
 0x936   :  { %v3096_v58 = vadd.f32 %v1288_v52, %v2931_v55  ;;  %v2547_v55 = vld [vmem:[%s3267_s9 + $0x28] sm:$0x3f]  }
 0x937   :  { %v1290_v53 = vpop.f32.mrf.mxu1  ;;  %2502 = vmatprep.subr.msk.bf16.mxu1 %vm693_vm10, %v2547_v55 }
 0x938   :  { %v1291_v54 = vadd.f32 %v2180_v35, %v1290_v53 }
 0x939   :  { %v2417_v57 = vpop.f32.mrf.mxu1 }
 0x93a   :  { %v3099_v59 = vadd.f32 %v1291_v54, %v2933_v56  ;;  %v2548_v56 = vld [vmem:[%s3267_s9 + $0x20] sm:$0xff]  }
 0x93c   :  { %v1329_v60 = vpack.c.bf16 %v3099_v59, %v3096_v58 }
 0x93e   :  { %v1331_v61 = vsel %vm693_vm10, %v1329_v60, 0 }
 0x93f   :  { %2419 = vmatpush3.bf16.msra.mxu0 %v1331_v61 }
 0x940   :  { %2458 = vmatprep.subr.bf16.mxu0 %v2711_v0 }
 0x942   :  { %2421 = vmatmul.mubr.msk.bf16.vlgmr.msra.gmra.mxu0 %vm683_vm11, %v2942_v62  ;;  %v1450_v62 = vsel %vm693_vm10, %v2547_v55, 0  ;;  %vm2079_vm10 = vcmp.eq.s32.totalorder %v2929_v51, 2 }
 0x943   :  { %2424 = vmatprep.mubr.msk.bf16.mxu0 %vm2712_vm2, %v2711_v0  ;;  %2433 = vmatpush3.bf16.msra.mxu1 %v1450_v62  ;;  %v2217_v62 = vld [vmem:[%s3263_s4 + $0x14] ss:$0 sm:$0xff] }
 0x944   :  { %2434 = vmatprep.subr.bf16.mxu1 %v2548_v56 }
 0x947   :  { %2435 = vmatpush3.bf16.msra.mxu1 %v2548_v56 }
 0x948   :  { %2436 = vmatprep.subr.bf16.mxu1 %v2549_v3 }
 0x94a   :  { %2425 = vmatmul.mubr.msk.bf16.gmra.mxu0 %vm683_vm11, %v2953_v5 }
 0x94b   :  { %2428 = vmatprep.mubr.msk.bf16.mxu0 %vm2712_vm2, %v2711_v0  ;;  %2437 = vmatpush3.bf16.msra.mxu1 %v2549_v3 }
 0x952   :  { %2429 = vmatmul.mubr.msk.bf16.gmra.mxu0 %vm683_vm11, %v2963_v8 }
 0x953   :  { %2462 = vmatprep.mubr.msk.bf16.mxu0 %vm2712_vm2, %v2711_v0 }
 0xa02   :  { %v1367_v5 = vpop.f32.mrf.mxu0 }
 0xa04   :  { %v2422_v63 = vpop.f32.mrf.mxu0 }
 0xa06   :  { %v1370_v8 = vpop.f32.mrf.mxu0 }
 0xa07   :  { %v2521_v1 = vpack.i.bf16 %v1370_v8, %v1367_v5 }
 0xa08   :  { %v2423_v2 = vpop.f32.mrf.mxu0 }
 0xa09   :  { %2522 = vrot.lane.b32.xlu0 %v2521_v1, %s2714_s26 }
 0xa0a   :  { %v1375_v4 = vpop.f32.mrf.mxu0 }
 0xa0b   :  { %1397 = vrot.lane.b32.xlu1 %v1375_v4, %s2714_s26 }
 0xa0c   :  { %v2426_v6 = vpop.f32.mrf.mxu0 }
 0xa0e   :  { %v1378_v49 = vpop.f32.mrf.mxu0 }
 0xa10   :  { %v2427_v7 = vpop.f32.mrf.mxu0 }
 0xa12   :  { %v1383_v9 = vpop.f32.mrf.mxu0 }
 0xa13   :  { %v2526_v11 = vpack.i.bf16 %v1383_v9, %v1378_v49 }
 0xa14   :  { %v2430_v12 = vpop.f32.mrf.mxu0 }
 0xa15   :  { %2527 = vrot.lane.b32.xlu0 %v2526_v11, %s2715_s0 }
 0xa16   :  { %v1386_v13 = vpop.f32.mrf.mxu0 }
 0xa17   :  { %1409 = vrot.lane.b32.xlu1 %v1386_v13, %s2715_s0 }
 0xa18   :  { %v2431_v14 = vpop.f32.mrf.mxu0 }
 0xa19   :  { %1662 = vrot.lane.b32.xlu0 %v3096_v58, %s2716_s27 }
 0xa1b   :  { %1664 = vrot.lane.b32.xlu1 %v3099_v59, %s2716_s27 }
 0xa7b   :  { %v2523_v15 = vpop.permute.xlu0 %2522 }
 0xa7c   :  { %v2525_v16 = vunpack.i.h.bf16 %v2523_v15  ;;  %v2524_v17 = vunpack.i.l.bf16 %v2523_v15 }
 0xa7d   :  { %v1398_v18 = vpop.permute.xlu1 %1397 }
 0xa7e   :  { %v1415_v22 = vsel %vm683_vm11, %v2998_v50, %v2525_v16  ;;  %v1414_v23 = vsel %vm683_vm11, %v2996_v48, %v2524_v17  ;;  %v1416_v24 = vsel %vm683_vm11, %v2994_v47, %v1398_v18  ;;  %v2550_v48 = vld [vmem:[%s3268_s10 + $0x18] sm:$0xff]   ;;  %v2551_v47 = vld [vmem:[%s3268_s10 + $0x10] sm:$0xff]   ;;  %vm2094_vm11 = vcmask 23552  }
 0xa7f   :  { %2442 = vmatprep.subr.bf16.mxu1 %v2550_v48  ;;  %v2208_v50 = vld [vmem:[%s3263_s4 + $0x13] ss:$0 sm:$0xff] }
 0xa87   :  { %v2528_v19 = vpop.permute.xlu0 %2527 }
 0xa88   :  { %v2530_v20 = vunpack.i.h.bf16 %v2528_v19  ;;  %v2529_v21 = vunpack.i.l.bf16 %v2528_v19 }
 0xa89   :  { %v1410_v25 = vpop.permute.xlu1 %1409 }
 0xa8a   :  { %v1418_v26 = vsel %vm781_vm0, %v1415_v22, %v2530_v20  ;;  %v1417_v27 = vsel %vm781_vm0, %v1414_v23, %v2529_v21  ;;  %v1419_v28 = vsel %vm781_vm0, %v1416_v24, %v1410_v25  ;;  %v2552_v25 = vld [vmem:[%s3270_s11 + $0x14] ss:$0 sps:$4 sm:$0xff]  }
 0xa8b   :  { %v1420_v29 = vpack.c.bf16 %v1418_v26, %v1417_v27  ;;  %v1421_v30 = vpack.c.bf16 %v1419_v28, %v1419_v28  ;;  %v1728_v26 = vsel %vm986_vm3, %v2552_v25, 0  ;;  %v2553_v27 = vld [vmem:[%s3270_s11 + $0xc] sm:$0xff]   ;;  %v1663_v28 = vpop.permute.xlu0 %1662 }
 0xa8c   :  { %2459 = vmatpush3.bf16.msra.mxu0 %v1728_v26 }
 0xa8d   :  { %2438 = vmatprep.mubr.msk.bf16.mxu1 %vm808_vm1, %v1420_v29  ;;  %2460 = vmatprep.subr.bf16.mxu0 %v2711_v0 }
 0xa8e   :  { %2439 = vmatmul.mubr.msk.bf16.vlgmr.msra.gmra.mxu1 %vm808_vm1, %v1421_v30 }
 0xa8f   :  { %2443 = vmatpush3.bf16.msra.mxu1 %v2550_v48  ;;  %v1665_v48 = vpop.permute.xlu1 %1664 }
 0xa90   :  { %2444 = vmatprep.subr.bf16.mxu1 %v2551_v47  ;;  %2461 = vmatpush3.bf16.msra.mxu0 %v2553_v27 }
 0xa91   :  { %2474 = vmatprep.subr.bf16.mxu0 %v2711_v0 }
 0xa93   :  { %2445 = vmatpush3.bf16.msra.mxu1 %v2551_v47 }
 0xa94   :  { %2450 = vmatprep.subr.bf16.mxu1 %v2711_v0 }
 0xb4e   :  { %v2440_v31 = vpop.f32.mrf.mxu1 }
 0xb4f   :  { %v1495_v34 = vadd.f32 %v2440_v31, %v2208_v50 }
 0xb50   :  { %v1486_v36 = vpop.f32.mrf.mxu1 }
 0xb51   :  { %v2216_v37 = vmul.f32 -1.442695, %v1495_v34  ;;  %v1487_v38 = vadd.f32 %v2208_v50, %v1486_v36 }
 0xb52   :  { %v2441_v39 = vpop.f32.mrf.mxu1 }
 0xb53   :  { %2653 = vpow2.f32 %v2216_v37  ;;  %v2214_v40 = vmul.f32 -1.442695, %v1487_v38 }
 0xb54   :  { %v1489_v41 = vpop.f32.mrf.mxu1 }
 0xb55   :  { %2655 = vpow2.f32 %v2214_v40  ;;  %v1490_v42 = vadd.f32 %v2208_v50, %v1489_v41 }
 0xb57   :  { %v2215_v32 = vmul.f32 -1.442695, %v1490_v42 }
 0xb59   :  { %2657 = vpow2.f32 %v2215_v32 }
 0xb60   :  { %v2654_v43 = vpop.eup %2653 }
 0xb61   :  { %v1511_v44 = vadd.f32 1.0, %v2654_v43 }
 0xb62   :  { %v2656_v33 = vpop.eup %2655 }
 0xb63   :  { %v1509_v35 = vadd.f32 1.0, %v2656_v33  ;;  %2659 = vrcp.f32 %v1511_v44 }
 0xb65   :  { %2661 = vrcp.f32 %v1509_v35 }
 0xb66   :  { %v2658_v45 = vpop.eup %2657 }
 0xb67   :  { %v1510_v46 = vadd.f32 1.0, %v2658_v45 }
 0xb69   :  { %2663 = vrcp.f32 %v1510_v46 }
 0xb70   :  { %v2660_v52 = vpop.eup %2659 }
 0xb71   :  { %v1520_v57 = vmul.f32 %v2660_v52, %v1495_v34 }
 0xb72   :  { %v2662_v53 = vpop.eup %2661 }
 0xb73   :  { %v1518_v60 = vmul.f32 %v2662_v53, %v1487_v38  ;;  %v1522_v56 = vpack.c.bf16 %v1520_v57, %v1520_v57 }
 0xb76   :  { %v2664_v54 = vpop.eup %2663 }
 0xb77   :  { %v1519_v61 = vmul.f32 %v2664_v54, %v1490_v42 }
 0xb79   :  { %v1521_v55 = vpack.c.bf16 %v1519_v61, %v1518_v60 }
 0xb7b   :  { %2446 = vmatprep.mubr.msk.bf16.mxu1 %vm178_vm6, %v1521_v55 }
 0xb7c   :  { %2447 = vmatmul.mubr.msk.bf16.vlgmr.msra.gmra.mxu1 %vm178_vm6, %v1522_v56 }
 0xb7d   :  { %2454 = vmatprep.mubr.msk.bf16.mxu1 %vm2712_vm2, %v2711_v0 }
 0xc3c   :  { %v2448_v5 = vpop.f32.mrf.mxu1 }
 0xc3d   :  { %v1588_v63 = vadd.f32 %v2448_v5, %v2217_v62 }
 0xc3e   :  { %v1579_v8 = vpop.f32.mrf.mxu1 }
 0xc3f   :  { %v2224_v1 = vmul.f32 -1.442695, %v1588_v63  ;;  %v1580_v2 = vadd.f32 %v2217_v62, %v1579_v8  ;;  %v2226_v8 = vld [vmem:[%s3263_s4 + $0x15] ss:$0 sm:$0xff] }
 0xc40   :  { %v2449_v3 = vpop.f32.mrf.mxu1 }
 0xc41   :  { %2665 = vpow2.f32 %v2224_v1  ;;  %v2222_v4 = vmul.f32 -1.442695, %v1580_v2  ;;  %v2227_v3 = vld [vmem:[%s3263_s4 + $0x16] ss:$0 sm:$0xff] }
 0xc42   :  { %v1582_v6 = vpop.f32.mrf.mxu1 }
 0xc43   :  { %2667 = vpow2.f32 %v2222_v4  ;;  %v1583_v49 = vadd.f32 %v2217_v62, %v1582_v6 }
 0xc45   :  { %v2223_v7 = vmul.f32 -1.442695, %v1583_v49 }
 0xc47   :  { %2669 = vpow2.f32 %v2223_v7 }
 0xc4e   :  { %v2666_v9 = vpop.eup %2665 }
 0xc4f   :  { %v1604_v11 = vadd.f32 1.0, %v2666_v9 }
 0xc50   :  { %v2668_v12 = vpop.eup %2667 }
 0xc51   :  { %2671 = vrcp.f32 %v1604_v11  ;;  %v1602_v13 = vadd.f32 1.0, %v2668_v12  ;;  %v2554_v11 = vld [vmem:[%s3271_s12 + $0x18] sm:$0xff]   ;;  %v2555_v12 = vld [vmem:[%s3271_s12 + $0x10] sm:$0xff]  }
 0xc53   :  { %2673 = vrcp.f32 %v1602_v13  ;;  %v2228_v13 = vld [vmem:[%s3263_s4 + $0x17] ss:$0 sm:$0xff] }
 0xc54   :  { %v2670_v14 = vpop.eup %2669 }
 0xc55   :  { %v1603_v15 = vadd.f32 1.0, %v2670_v14 }
 0xc57   :  { %2675 = vrcp.f32 %v1603_v15 }
 0xc5e   :  { %v2672_v16 = vpop.eup %2671 }
 0xc5f   :  { %v1613_v17 = vmul.f32 %v2672_v16, %v1588_v63 }
 0xc60   :  { %v2674_v19 = vpop.eup %2673 }
 0xc61   :  { %v1615_v18 = vpack.c.bf16 %v1613_v17, %v1613_v17  ;;  %v1611_v22 = vmul.f32 %v2674_v19, %v1580_v2 }
 0xc63   :  { %v1617_v20 = vsel %vm986_vm3, %v1615_v18, 0 }
 0xc64   :  { %v2676_v21 = vpop.eup %2675  ;;  %2451 = vmatpush3.bf16.msra.mxu1 %v1617_v20 }
 0xc65   :  { %v1612_v23 = vmul.f32 %v2676_v21, %v1583_v49  ;;  %2452 = vmatprep.subr.bf16.mxu1 %v2711_v0 }
 0xc67   :  { %v1614_v24 = vpack.c.bf16 %v1612_v23, %v1611_v22 }
 0xc69   :  { %2453 = vmatpush3.bf16.msra.mxu1 %v1614_v24 }
 0xc6a   :  { %2466 = vmatprep.subr.bf16.mxu1 %v2711_v0 }
 0xc6c   :  { %2455 = vmatmul.mubr.msk.bf16.vlgmr.msra.gmra.mxu1 %vm982_vm7, %v3036_v10 }
 0xc6d   :  { %2470 = vmatprep.mubr.msk.bf16.mxu1 %vm2712_vm2, %v2711_v0  ;;  %2467 = vmatpush3.bf16.msra.mxu1 %v2554_v11 }
 0xc6e   :  { %2468 = vmatprep.subr.bf16.mxu1 %v2711_v0 }
 0xc71   :  { %2469 = vmatpush3.bf16.msra.mxu1 %v2555_v12 }
 0xc72   :  { %2482 = vmatprep.subr.bf16.mxu1 %v2711_v0 }
 0xd2c   :  { %v1653_v10 = vpop.f32.mrf.mxu1 }
 0xd2d   :  { %v1668_v30 = vsel %vm1039_vm8, %v1653_v10, %v1663_v28 }
 0xd2e   :  { %v2456_v29 = vpop.f32.mrf.mxu1  ;;  %v1670_v31 = vsel %vm982_vm7, %v1668_v30, 0.0 }
 0xd30   :  { %v1656_v47 = vpop.f32.mrf.mxu1 }
 0xd31   :  { %v1669_v50 = vsel %vm1039_vm8, %v1656_v47, %v1665_v48  ;;  %v2557_v48 = vld [vmem:[%s3272_s13 + $0x10] sm:$0xff]   ;;  %v2234_v47 = vld [vmem:[%s3263_s4 + $0x18] ss:$0 sm:$0xff] }
 0xd32   :  { %v1671_v34 = vsel %vm1043_vm9, %v1669_v50, 0.0  ;;  %v2457_v36 = vpop.f32.mrf.mxu1 }
 0xd33   :  { %v1672_v37 = vadd.f32 %v1671_v34, %v1670_v31 }
 0xd35   :  { %v1673_v38 = vrot.slane %v1672_v37, 4 }
 0xd37   :  { %v1674_v39 = vadd.f32 %v1673_v38, %v1672_v37 }
 0xd39   :  { %v1675_v40 = vrot.slane %v1674_v39, 2 }
 0xd3b   :  { %v1676_v41 = vadd.f32 %v1675_v40, %v1674_v39 }
 0xd3d   :  { %v1677_v42 = vrot.slane %v1676_v41, 1 }
 0xd3f   :  { %v1678_v32 = vadd.f32 %v1677_v42, %v1676_v41 }
 0xd41   :  { %v1679_v43 = vmul.f32 0.083333336, %v1678_v32 }
 0xd43   :  { %v1680_v33 = vsub.f32 %v1668_v30, %v1679_v43  ;;  %v1681_v44 = vsub.f32 %v1669_v50, %v1679_v43  ;;  %v2556_v30 = vld [vmem:[%s3272_s13 + $0x18] sm:$0xff]  }
 0xd45   :  { %v1682_v35 = vmul.f32 %v1680_v33, %v1680_v33  ;;  %v1683_v45 = vmul.f32 %v1681_v44, %v1681_v44 }
 0xd47   :  { %v1684_v46 = vsel %vm982_vm7, %v1682_v35, 0.0  ;;  %v1685_v52 = vsel %vm1043_vm9, %v1683_v45, 0.0 }
 0xd48   :  { %v1686_v53 = vadd.f32 %v1685_v52, %v1684_v46  ;;  %v2558_v52 = vld [vmem:[%s3273_s14] sm:$0xff]  }
 0xd4a   :  { %v1687_v54 = vrot.slane %v1686_v53, 4 }
 0xd4c   :  { %v1688_v57 = vadd.f32 %v1687_v54, %v1686_v53  ;;  %v2240_v53 = vld [vmem:[%s3263_s4 + $0x19] ss:$0 sm:$0xff] }
 0xd4e   :  { %v1689_v60 = vrot.slane %v1688_v57, 2 }
 0xd50   :  { %v1690_v61 = vadd.f32 %v1689_v60, %v1688_v57 }
 0xd52   :  { %v1691_v55 = vrot.slane %v1690_v61, 1 }
 0xd54   :  { %v1692_v56 = vadd.f32 %v1691_v55, %v1690_v61 }
 0xd56   :  { %v1693_v62 = vmul.f32 0.083333336, %v1692_v56 }
 0xd58   :  { %v1694_v5 = vadd.f32 1e-05, %v1693_v62 }
 0xd5a   :  { %2677 = vrsqrt.f32 %v1694_v5 }
 0xd67   :  { %v2678_v63 = vpop.eup %2677 }
 0xd68   :  { %v1696_v1 = vmul.f32 %v2678_v63, %v1680_v33  ;;  %v1697_v2 = vmul.f32 %v2678_v63, %v1681_v44 }
 0xd6a   :  { %v1702_v4 = vmul.f32 %v2226_v8, %v1696_v1  ;;  %v1703_v6 = vmul.f32 %v2226_v8, %v1697_v2  ;;  %v2559_v8 = vld [vmem:[%s3274_s15 + $0x18] sm:$0xff]   ;;  %v2560_v1 = vld [vmem:[%s3274_s15 + $0x10] sm:$0xff]  }
 0xd6b   :  { %v2244_v2 = vld [vmem:[%s3263_s4 + $0x1a] ss:$0 sm:$0xff] }
 0xd6c   :  { %v1708_v49 = vadd.f32 %v2227_v3, %v1702_v4  ;;  %v1709_v7 = vadd.f32 %v2227_v3, %v1703_v6 }
 0xd6e   :  { %v1710_v9 = vpack.c.bf16 %v1709_v7, %v1708_v49 }
 0xd70   :  { %2463 = vmatmul.mubr.msk.bf16.vlgmr.msra.gmra.mxu0 %vm982_vm7, %v1710_v9 }
 0xd71   :  { %2478 = vmatprep.mubr.msk.bf16.mxu0 %vm2712_vm2, %v2711_v0  ;;  %2475 = vmatpush3.bf16.msra.mxu0 %v2556_v30 }
 0xd72   :  { %2476 = vmatprep.subr.bf16.mxu0 %v2711_v0 }
 0xd75   :  { %2477 = vmatpush3.bf16.msra.mxu0 %v2557_v48 }
 0xd76   :  { %2488 = vmatprep.subr.bf16.mxu0 %v2711_v0 }
 0xe30   :  { %v1764_v14 = vpop.f32.mrf.mxu0 }
 0xe31   :  { %v1765_v15 = vadd.f32 %v2228_v13, %v1764_v14 }
 0xe32   :  { %v2464_v16 = vpop.f32.mrf.mxu0 }
 0xe33   :  { %v2232_v17 = vmul.f32 -1.442695, %v1765_v15 }
 0xe34   :  { %v1767_v18 = vpop.f32.mrf.mxu0 }
 0xe35   :  { %2679 = vpow2.f32 %v2232_v17  ;;  %v1768_v19 = vadd.f32 %v2228_v13, %v1767_v18 }
 0xe36   :  { %v2465_v20 = vpop.f32.mrf.mxu0 }
 0xe37   :  { %v2233_v21 = vmul.f32 -1.442695, %v1768_v19 }
 0xe39   :  { %2681 = vpow2.f32 %v2233_v21  ;;  %v2249_v21 = vld [vmem:[%s3263_s4 + $0x1b] ss:$0 sm:$0xff] }
 0xe42   :  { %v2680_v22 = vpop.eup %2679 }
 0xe43   :  { %v1777_v23 = vadd.f32 1.0, %v2680_v22 }
 0xe45   :  { %2683 = vrcp.f32 %v1777_v23 }
 0xe46   :  { %v2682_v24 = vpop.eup %2681 }
 0xe47   :  { %v1778_v25 = vadd.f32 1.0, %v2682_v24 }
 0xe49   :  { %2685 = vrcp.f32 %v1778_v25 }
 0xe52   :  { %v2684_v26 = vpop.eup %2683 }
 0xe53   :  { %v1783_v10 = vmul.f32 %v2684_v26, %v1765_v15 }
 0xe56   :  { %v2686_v27 = vpop.eup %2685 }
 0xe57   :  { %v1784_v28 = vmul.f32 %v2686_v27, %v1768_v19 }
 0xe59   :  { %v1785_v29 = vpack.c.bf16 %v1784_v28, %v1783_v10 }
 0xe5b   :  { %2471 = vmatmul.mubr.msk.bf16.vlgmr.msra.gmra.mxu1 %vm178_vm6, %v1785_v29 }
 0xe5c   :  { %2484 = vmatprep.mubr.msk.bf16.mxu1 %vm2712_vm2, %v2711_v0  ;;  %2483 = vmatpush3.bf16.msra.mxu1 %v2558_v52 }
 0xf1b   :  { %v1839_v50 = vpop.f32.mrf.mxu1 }
 0xf1c   :  { %v1840_v31 = vadd.f32 %v2234_v47, %v1839_v50 }
 0xf1d   :  { %v2472_v34 = vpop.f32.mrf.mxu1 }
 0xf1e   :  { %v2238_v36 = vmul.f32 -1.442695, %v1840_v31 }
 0xf1f   :  { %v1842_v37 = vpop.f32.mrf.mxu1 }
 0xf20   :  { %2687 = vpow2.f32 %v2238_v36  ;;  %v1843_v38 = vadd.f32 %v2234_v47, %v1842_v37 }
 0xf21   :  { %v2473_v39 = vpop.f32.mrf.mxu1 }
 0xf22   :  { %v2239_v40 = vmul.f32 -1.442695, %v1843_v38 }
 0xf24   :  { %2689 = vpow2.f32 %v2239_v40 }
 0xf2d   :  { %v2688_v41 = vpop.eup %2687 }
 0xf2e   :  { %v1852_v42 = vadd.f32 1.0, %v2688_v41 }
 0xf30   :  { %2691 = vrcp.f32 %v1852_v42 }
 0xf31   :  { %v2690_v32 = vpop.eup %2689 }
 0xf32   :  { %v1853_v43 = vadd.f32 1.0, %v2690_v32 }
 0xf34   :  { %2693 = vrcp.f32 %v1853_v43 }
 0xf3d   :  { %v2692_v33 = vpop.eup %2691 }
 0xf3e   :  { %v1858_v35 = vmul.f32 %v2692_v33, %v1840_v31 }
 0xf41   :  { %v2694_v44 = vpop.eup %2693 }
 0xf42   :  { %v1859_v45 = vmul.f32 %v2694_v44, %v1843_v38 }
 0xf44   :  { %v1860_v46 = vpack.c.bf16 %v1859_v45, %v1858_v35 }
 0xf46   :  { %2479 = vmatmul.mubr.msk.bf16.vlgmr.msra.gmra.mxu0 %vm178_vm6, %v1860_v46  ;;  %vm2034_vm6 = vcmask 523264  }
 0xf47   :  { %2496 = vmatprep.mubr.msk.bf16.mxu0 %vm2712_vm2, %v2711_v0  ;;  %vm1937_vm2 = vcmask 130048   ;;  %2489 = vmatpush3.bf16.msra.mxu0 %v2559_v8 }
 0xf48   :  { %2490 = vmatprep.subr.bf16.mxu0 %v2711_v0 }
 0xf4b   :  { %2491 = vmatpush3.bf16.msra.mxu0 %v2560_v1 }
 0xf4c   :  { %2492 = vmatprep.subr.bf16.mxu0 %v2711_v0 }
0x1006   :  { %v1914_v54 = vpop.f32.mrf.mxu0 }
0x1007   :  { %v1915_v60 = vadd.f32 %v2240_v53, %v1914_v54 }
0x1008   :  { %v2480_v57 = vpop.f32.mrf.mxu0 }
0x1009   :  { %v1921_v62 = vadd.f32 %v1915_v60, %v3096_v58  ;;  %v2561_v58 = vld [vmem:[%s3274_s15 + $0x8] sm:$0xff]  }
0x100a   :  { %v1917_v61 = vpop.f32.mrf.mxu0  ;;  %2493 = vmatpush3.bf16.msra.mxu0 %v2561_v58 }
0x100b   :  { %v1918_v55 = vadd.f32 %v2240_v53, %v1917_v61  ;;  %2494 = vmatprep.subr.bf16.mxu0 %v2711_v0 }
0x100c   :  { %v2481_v56 = vpop.f32.mrf.mxu0 }
0x100d   :  { %v1922_v5 = vadd.f32 %v1918_v55, %v3099_v59  ;;  %v2562_v59 = vld [vmem:[%s3274_s15] sm:$0xff]  }
0x100e   :  { %2495 = vmatpush3.bf16.msra.mxu0 %v2562_v59 }
0x100f   :  { %v1923_v63 = vpack.c.bf16 %v1922_v5, %v1921_v62 }
0x1011   :  { %2485 = vmatmul.mubr.msk.bf16.vlgmr.msra.gmra.mxu1 %vm1937_vm2, %v1923_v63 }
0x10d1   :  { %v1975_v3 = vpop.f32.mrf.mxu1 }
0x10d2   :  { %v1976_v4 = vadd.f32 %v2244_v2, %v1975_v3 }
0x10d3   :  { %v2486_v6 = vpop.f32.mrf.mxu1 }
0x10d4   :  { %v2247_v49 = vmul.f32 -1.442695, %v1976_v4 }
0x10d5   :  { %v1978_v7 = vpop.f32.mrf.mxu1 }
0x10d6   :  { %2695 = vpow2.f32 %v2247_v49  ;;  %v1979_v9 = vadd.f32 %v2244_v2, %v1978_v7 }
0x10d7   :  { %v2487_v11 = vpop.f32.mrf.mxu1 }
0x10d8   :  { %v2248_v12 = vmul.f32 -1.442695, %v1979_v9 }
0x10da   :  { %2697 = vpow2.f32 %v2248_v12 }
0x10e3   :  { %v2696_v0 = vpop.eup %2695 }
0x10e4   :  { %v1988_v13 = vadd.f32 1.0, %v2696_v0 }
0x10e6   :  { %2699 = vrcp.f32 %v1988_v13 }
0x10e7   :  { %v2698_v14 = vpop.eup %2697 }
0x10e8   :  { %v1989_v15 = vadd.f32 1.0, %v2698_v14 }
0x10ea   :  { %2701 = vrcp.f32 %v1989_v15 }
0x10f3   :  { %v2700_v16 = vpop.eup %2699 }
0x10f4   :  { %v1994_v18 = vmul.f32 %v2700_v16, %v1976_v4 }
0x10f7   :  { %v2702_v17 = vpop.eup %2701 }
0x10f8   :  { %v1995_v19 = vmul.f32 %v2702_v17, %v1979_v9 }
0x10fa   :  { %v1996_v20 = vpack.c.bf16 %v1995_v19, %v1994_v18 }
0x10fc   :  { %2497 = vmatmul.mubr.msk.bf16.vlgmr.msra.gmra.mxu0 %vm2034_vm6, %v1996_v20 }
0x11bc   :  { %v2072_v22 = vpop.f32.mrf.mxu0 }
0x11bd   :  { %v2073_v23 = vadd.f32 %v2249_v21, %v2072_v22 }
0x11be   :  { %v2498_v24 = vpop.f32.mrf.mxu0 }
0x11bf   :  { %v2255_v25 = vmul.f32 -1.442695, %v2073_v23 }
0x11c0   :  { %v2075_v26 = vpop.f32.mrf.mxu0 }
0x11c1   :  { %2703 = vpow2.f32 %v2255_v25  ;;  %v2076_v27 = vadd.f32 %v2249_v21, %v2075_v26 }
0x11c2   :  { %v2499_v10 = vpop.f32.mrf.mxu0 }
0x11c3   :  { %v2256_v28 = vmul.f32 -1.442695, %v2076_v27 }
0x11c5   :  { %2705 = vpow2.f32 %v2256_v28 }
0x11ce   :  { %v2704_v29 = vpop.eup %2703 }
0x11cf   :  { %v2086_v30 = vadd.f32 1.0, %v2704_v29 }
0x11d1   :  { %2707 = vrcp.f32 %v2086_v30 }
0x11d2   :  { %v2706_v48 = vpop.eup %2705 }
0x11d3   :  { %v2087_v47 = vadd.f32 1.0, %v2706_v48 }
0x11d5   :  { %2709 = vrcp.f32 %v2087_v47 }
0x11de   :  { %v2708_v50 = vpop.eup %2707 }
0x11df   :  { %v2092_v31 = vsel %vm2079_vm10, %v2708_v50, %v2073_v23 }
0x11e0   :  { %v2095_v34 = vsel %vm2094_vm11, %v2092_v31, 0.0 }
0x11e1   :  { %2097 = vst [vmem:[%s3275_s16] sm:$0xff] %v2095_v34 }
0x11e2   :  { %v2710_v36 = vpop.eup %2709 }
0x11e3   :  { %v2093_v37 = vsel %vm2079_vm10, %v2710_v36, %v2076_v27 }
0x11e4   :  { %v2096_v38 = vsel %vm2094_vm11, %v2093_v37, 0.0 }
0x11e5   :  { %2098 = vst [vmem:[%s3275_s16 + $0x8] sm:$0xf] %v2096_v38 }

</bundles_post_ra>
